<compile_context>
chip_gen: v7x
topology: tpu7x:2x2x1
jax: 0.10.0
libtpu: 0.0.40
codegen_flags: <defaults>
</compile_context>

<pallas_src>
import math

import jax
import jax.numpy as jnp
from jax.experimental import pallas as pl
from jax.experimental.pallas import tpu as pltpu

# ---- small shapes consistent with the module (shrunk backbone width) -------
B = 8            # batch (fills one sublane group)
C_IN = 8         # input channels
H = W = 16       # spatial
HW = H * W
N_MID = 256      # backbone feature width (stands in for 2048/1024/384)
EMBED = 128      # embedding_size (Feature_Extractor default)
N_CLASS = 100    # nb_classes (Metric_Model default n_class=100)
NC_PAD = 128     # class dim padded to a full 128-lane tile
ALPHA = 32.0
MRG = 0.1
EPS = 1e-5
EXP_AM = math.exp(ALPHA * MRG)   # exp(alpha*mrg), compile-time constant

# rows of the packed parameter slab (16, N_MID):
#   0..7  : w_stem (C_IN rows)     8 : b_stem      9 : ln_g     10 : ln_b
#   11    : bn_g                  12 : bn_b       13 : b_fc (first EMBED lanes)
#   14,15 : zero padding (keeps the sublane count at a full 8-multiple)
_R_BSTEM, _R_LNG, _R_LNB, _R_BNG, _R_BNB, _R_BFC = 8, 9, 10, 11, 12, 13

VMEM_SPEC = pl.BlockSpec(memory_space=pltpu.MemorySpace.VMEM)
SMEM_SPEC = pl.BlockSpec(memory_space=pltpu.MemorySpace.SMEM)


# --------------------------- fused kernel -----------------------------------
def _metric_model_kernel(x_ref, pk_ref, w_fc_ref, pnt_ref, label_ref, o_ref):
    # ---- backbone stand-in: per-channel GAP + VPU broadcast-MAC stem -------
    # (avoids a K=8 MXU matmul; each channel is one lane-reduce + one FMA sweep)
    feat = pk_ref[_R_BSTEM:_R_BSTEM + 1, :]                     # (1, N_MID)
    for c in range(C_IN):
        pooled_c = jnp.mean(x_ref[:, c, :], axis=1, keepdims=True)   # (B, 1)
        feat = feat + pooled_c * pk_ref[c:c + 1, :]             # (B, N_MID)

    # ---- LayerNorm over features (two-pass biased variance, f32) -----------
    mu = jnp.mean(feat, axis=1, keepdims=True)
    xc = feat - mu
    var = jnp.mean(xc * xc, axis=1, keepdims=True)
    h = (xc * jax.lax.rsqrt(var + EPS) * pk_ref[_R_LNG:_R_LNG + 1, :]
         + pk_ref[_R_LNB:_R_LNB + 1, :])

    # ---- BatchNorm1d, training-mode batch stats (two-pass biased, f32) -----
    bmu = jnp.mean(h, axis=0, keepdims=True)
    hc = h - bmu
    bvar = jnp.mean(hc * hc, axis=0, keepdims=True)
    h = (hc * jax.lax.rsqrt(bvar + EPS) * pk_ref[_R_BNG:_R_BNG + 1, :]
         + pk_ref[_R_BNB:_R_BNB + 1, :])

    # ---- Linear(n_mid -> embedding): bf16 MXU operands, f32 accumulate -----
    z = (jnp.dot(h.astype(jnp.bfloat16), w_fc_ref[...],
                 preferred_element_type=jnp.float32)
         + pk_ref[_R_BFC:_R_BFC + 1, :EMBED])                   # (B, EMBED)

    # ---- Proxy-Anchor loss --------------------------------------------------
    # l2-normalize embeddings (f32); proxies arrive pre-normalized, transposed
    # and zero-padded to NC_PAD lanes, so cosine is a lane-dense bf16 matmul.
    zn = z * jax.lax.rsqrt(jnp.sum(z * z, axis=1, keepdims=True) + 1e-12)
    cos = jnp.dot(zn.astype(jnp.bfloat16), pnt_ref[...],
                  preferred_element_type=jnp.float32)           # (B, NC_PAD)

    # one-hot built in-kernel from SMEM labels (no padded VMEM input DMA)
    cls_ids = jax.lax.broadcasted_iota(jnp.int32, (B, NC_PAD), 1)
    row_ids = jax.lax.broadcasted_iota(jnp.int32, (B, NC_PAD), 0)
    pos = jnp.zeros((B, NC_PAD), jnp.float32)
    for b in range(B):
        hit = jnp.logical_and(row_ids == b, cls_ids == label_ref[b])
        pos = jnp.where(hit, 1.0, pos)
    valid = (cls_ids < N_CLASS).astype(jnp.float32)   # mask out padded classes
    neg = valid - pos                                 # NOT 1 - pos (padding!)

    # exp(alpha*cos) once on the EUP; pos side via approx reciprocal (EUP).
    # Masked entries are dropped with where() so an overflowed exp in a
    # masked slot can never produce 0*inf = NaN.
    e = jnp.exp(ALPHA * cos)                                    # (B, NC_PAD)
    pos_exp = EXP_AM * pl.reciprocal(e, approx=True)            # exp(-a(cos-m))
    neg_exp = EXP_AM * e                                        # exp( a(cos+m))
    p_sum = jnp.sum(jnp.where(pos > 0.0, pos_exp, 0.0), axis=0, keepdims=True)
    n_sum = jnp.sum(jnp.where(neg > 0.0, neg_exp, 0.0), axis=0, keepdims=True)

    with_pos = (jnp.sum(pos, axis=0, keepdims=True) > 0.0).astype(jnp.float32)
    num_valid = jnp.sum(with_pos, keepdims=True)                # (1, 1)
    pos_term = (jnp.sum(jnp.log1p(p_sum), keepdims=True)
                * pl.reciprocal(num_valid, approx=True))
    neg_term = jnp.sum(jnp.log1p(n_sum), keepdims=True) * (1.0 / N_CLASS)
    o_ref[...] = pos_term + neg_term                            # (1, 1)


# --------------------------- wrapper ----------------------------------------
@jax.jit
def metric_model_forward(x, t, params):
    """Returns (jm, metrics) like Metric_Model.forward (forward pass only)."""
    label = jnp.squeeze(t, axis=-1).astype(jnp.int32)            # (B,1)->(B,)
    xf = x.reshape(B, C_IN, HW).astype(jnp.float32)

    # Pack the eight small f32 params into one (16, N_MID) slab (1 DMA).
    b_fc_pad = jnp.zeros((1, N_MID), jnp.float32).at[:, :EMBED].set(
        params["b_fc"])
    packed = jnp.concatenate(
        [params["w_stem"],                                       # rows 0..7
         params["b_stem"], params["ln_g"], params["ln_b"],
         params["bn_g"], params["bn_b"], b_fc_pad,
         jnp.zeros((2, N_MID), jnp.float32)], axis=0)            # (16, N_MID)

    # bf16 MXU operands prepared in the (cheap, XLA-fused) wrapper.
    w_fc_bf16 = params["w_fc"].astype(jnp.bfloat16)
    P = params["proxies"]
    Pn = P * jax.lax.rsqrt(jnp.sum(P * P, axis=1, keepdims=True) + 1e-12)
    pnt = jnp.zeros((EMBED, NC_PAD), jnp.float32).at[:, :N_CLASS].set(Pn.T)
    pnt_bf16 = pnt.astype(jnp.bfloat16)

    jm2d = pl.pallas_call(
        _metric_model_kernel,
        out_shape=jax.ShapeDtypeStruct((1, 1), jnp.float32),
        in_specs=[VMEM_SPEC, VMEM_SPEC, VMEM_SPEC, VMEM_SPEC, SMEM_SPEC],
        out_specs=VMEM_SPEC,
    )(xf, packed, w_fc_bf16, pnt_bf16, label)

    jm = jm2d[0, 0]
    metrics = {"J_m": jm}
    return jm, metrics


# --------------------------- references (pure jnp) ---------------------------
def reference_forward_f32(x, t, params):
    """Full-f32 ground truth (HIGHEST-precision matmuls)."""
    hi = jax.lax.Precision.HIGHEST
    label = jnp.squeeze(t, -1)
    xf = x.reshape(B, C_IN, HW).astype(jnp.float32)
    pooled = jnp.mean(xf, axis=2)
    feat = jnp.dot(pooled, params["w_stem"], precision=hi) + params["b_stem"]
    mu = feat.mean(1, keepdims=True)
    var = ((feat - mu) ** 2).mean(1, keepdims=True)
    h = (feat - mu) / jnp.sqrt(var + EPS) * params["ln_g"] + params["ln_b"]
    bmu = h.mean(0, keepdims=True)
    bvar = ((h - bmu) ** 2).mean(0, keepdims=True)
    h = (h - bmu) / jnp.sqrt(bvar + EPS) * params["bn_g"] + params["bn_b"]
    z = jnp.dot(h, params["w_fc"], precision=hi) + params["b_fc"]
    Xn = z / jnp.linalg.norm(z, axis=1, keepdims=True)
    Pn = params["proxies"] / jnp.linalg.norm(params["proxies"], axis=1,
                                             keepdims=True)
    cos = jnp.dot(Xn, Pn.T, precision=hi)
    pos = jax.nn.one_hot(label, N_CLASS, dtype=jnp.float32)
    neg = 1.0 - pos
    p_sum = (pos * jnp.exp(-ALPHA * (cos - MRG))).sum(0)
    n_sum = (neg * jnp.exp(ALPHA * (cos + MRG))).sum(0)
    num_valid = (pos.sum(0) > 0).astype(jnp.float32).sum()
    return jnp.log1p(p_sum).sum() / num_valid + jnp.log1p(n_sum).sum() / N_CLASS


def reference_forward_matched(x, t, params):
    """Pure-jnp model of the kernel's numerics (bf16 MXU operands, same algebra)."""
    label = jnp.squeeze(t, -1)
    xf = x.reshape(B, C_IN, HW).astype(jnp.float32)
    pooled = jnp.mean(xf, axis=2)
    feat = pooled @ params["w_stem"] + params["b_stem"]
    mu = feat.mean(1, keepdims=True)
    xc = feat - mu
    var = (xc * xc).mean(1, keepdims=True)
    h = xc * jax.lax.rsqrt(var + EPS) * params["ln_g"] + params["ln_b"]
    bmu = h.mean(0, keepdims=True)
    hc = h - bmu
    bvar = (hc * hc).mean(0, keepdims=True)
    h = hc * jax.lax.rsqrt(bvar + EPS) * params["bn_g"] + params["bn_b"]
    z = jnp.dot(h.astype(jnp.bfloat16), params["w_fc"].astype(jnp.bfloat16),
                preferred_element_type=jnp.float32) + params["b_fc"]
    zn = z * jax.lax.rsqrt(jnp.sum(z * z, axis=1, keepdims=True) + 1e-12)
    P = params["proxies"]
    Pn = P * jax.lax.rsqrt(jnp.sum(P * P, axis=1, keepdims=True) + 1e-12)
    cos = jnp.dot(zn.astype(jnp.bfloat16), Pn.T.astype(jnp.bfloat16),
                  preferred_element_type=jnp.float32)
    pos = jax.nn.one_hot(label, N_CLASS, dtype=jnp.float32)
    neg = 1.0 - pos
    e = jnp.exp(ALPHA * cos)
    p_sum = (pos * (EXP_AM / e)).sum(0)
    n_sum = (neg * (EXP_AM * e)).sum(0)
    num_valid = (pos.sum(0) > 0).astype(jnp.float32).sum()
    return jnp.log1p(p_sum).sum() / num_valid + jnp.log1p(n_sum).sum() / N_CLASS


# --------------------------- params -----------------------------------------
def init_params(key):
    # Affine params get small random perturbations (instead of the exact
    # ones/zeros PyTorch defaults) so every packed-slab row is exercised by
    # the correctness check.
    ks = jax.random.split(key, 9)
    n = lambda k, s: jax.random.normal(k, s, jnp.float32)
    return {
        "w_stem": n(ks[0], (C_IN, N_MID)) / jnp.sqrt(float(C_IN)),
        "b_stem": 0.1 * n(ks[1], (1, N_MID)),
        "ln_g": 1.0 + 0.1 * n(ks[2], (1, N_MID)),
        "ln_b": 0.1 * n(ks[3], (1, N_MID)),
        "bn_g": 1.0 + 0.1 * n(ks[4], (1, N_MID)),
        "bn_b": 0.1 * n(ks[5], (1, N_MID)),
        "w_fc": n(ks[6], (N_MID, EMBED)) / jnp.sqrt(float(N_MID)),
        "b_fc": 0.1 * n(ks[7], (1, EMBED)),
        # proxies: kaiming_normal_ (fan_out) -> std = sqrt(2 / nb_classes)
        "proxies": n(ks[8], (N_CLASS, EMBED)) * jnp.sqrt(2.0 / float(N_CLASS)),
    }


if __name__ == "__main__":
    key = jax.random.PRNGKey(0)
    kx, kt, kp = jax.random.split(key, 3)
    x = jax.random.normal(kx, (B, C_IN, H, W), jnp.float32)       # NCHW input
    t = jax.random.randint(kt, (B, 1), 0, N_CLASS, dtype=jnp.int32)
    params = init_params(kp)

    jm, metrics = metric_model_forward(x, t, params)
    jm = jax.block_until_ready(jm)
    assert jnp.isfinite(jm), "loss is not finite"

    # Tight check against a reference using the kernel's exact numerics
    # (bf16 MXU operands, f32 elementwise); tolerance covers the EUP approx
    # reciprocal and MXU accumulation-order differences.
    ref_m = reference_forward_matched(x, t, params)
    assert jnp.allclose(jm, ref_m, rtol=1e-2, atol=1e-2), (float(jm), float(ref_m))

    # Loose sanity bound against the full-f32 reference: alpha=32 amplifies
    # the ~1e-3 cosine error from bf16 MXU operands by exp(alpha*dcos).
    ref_f = reference_forward_f32(x, t, params)
    assert jnp.allclose(jm, ref_f, rtol=0.15, atol=0.15), (float(jm), float(ref_f))

    print("KERNEL_OK")
</pallas_src>

<mosaic_0001>
module attributes {stable_mosaic.version = 11 : i64} {
  func.func @_metric_model_kernel(%arg0: memref<8x8x256xf32, #tpu.memory_space<vmem>>, %arg1: memref<16x256xf32, #tpu.memory_space<vmem>>, %arg2: memref<256x128xbf16, #tpu.memory_space<vmem>>, %arg3: memref<128x128xbf16, #tpu.memory_space<vmem>>, %arg4: memref<8xi32, #tpu.memory_space<smem>>, %arg5: memref<1x1xf32, #tpu.memory_space<vmem>>) attributes {dimension_semantics = [], scalar_prefetch = 0 : i64, scratch_operands = 0 : i64, tpu.core_type = #tpu.core_type<tc>} {
    %c8 = arith.constant 8 : index
    %c0 = arith.constant 0 : index
    %0 = vector.load %arg1[%c8, %c0] : memref<16x256xf32, #tpu.memory_space<vmem>>, vector<1x256xf32>
    %c0_0 = arith.constant 0 : index
    %c0_1 = arith.constant 0 : index
    %c0_2 = arith.constant 0 : index
    %1 = vector.load %arg0[%c0_0, %c0_1, %c0_2] : memref<8x8x256xf32, #tpu.memory_space<vmem>>, vector<8x1x256xf32>
    %2 = vector.shape_cast %1 : vector<8x1x256xf32> to vector<8x256xf32>
    %cst = arith.constant dense<0.000000e+00> : vector<8xf32>
    %3 = vector.multi_reduction <add>, %2, %cst [1] : vector<8x256xf32> to vector<8xf32>
    %4 = vector.shape_cast %3 : vector<8xf32> to vector<8x1xf32>
    %cst_3 = arith.constant 2.560000e+02 : f32
    %5 = vector.broadcast %cst_3 : f32 to vector<8x1xf32>
    %6 = arith.divf %4, %5 : vector<8x1xf32>
    %c0_4 = arith.constant 0 : index
    %c0_5 = arith.constant 0 : index
    %7 = vector.load %arg1[%c0_4, %c0_5] : memref<16x256xf32, #tpu.memory_space<vmem>>, vector<1x256xf32>
    %8 = vector.broadcast %6 : vector<8x1xf32> to vector<8x256xf32>
    %9 = vector.broadcast %7 : vector<1x256xf32> to vector<8x256xf32>
    %10 = arith.mulf %8, %9 : vector<8x256xf32>
    %11 = vector.broadcast %0 : vector<1x256xf32> to vector<8x256xf32>
    %12 = arith.addf %11, %10 : vector<8x256xf32>
    %c0_6 = arith.constant 0 : index
    %c1 = arith.constant 1 : index
    %c0_7 = arith.constant 0 : index
    %13 = vector.load %arg0[%c0_6, %c1, %c0_7] : memref<8x8x256xf32, #tpu.memory_space<vmem>>, vector<8x1x256xf32>
    %14 = vector.shape_cast %13 : vector<8x1x256xf32> to vector<8x256xf32>
    %cst_8 = arith.constant dense<0.000000e+00> : vector<8xf32>
    %15 = vector.multi_reduction <add>, %14, %cst_8 [1] : vector<8x256xf32> to vector<8xf32>
    %16 = vector.shape_cast %15 : vector<8xf32> to vector<8x1xf32>
    %cst_9 = arith.constant 2.560000e+02 : f32
    %17 = vector.broadcast %cst_9 : f32 to vector<8x1xf32>
    %18 = arith.divf %16, %17 : vector<8x1xf32>
    %c1_10 = arith.constant 1 : index
    %c0_11 = arith.constant 0 : index
    %19 = vector.load %arg1[%c1_10, %c0_11] : memref<16x256xf32, #tpu.memory_space<vmem>>, vector<1x256xf32>
    %20 = vector.broadcast %18 : vector<8x1xf32> to vector<8x256xf32>
    %21 = vector.broadcast %19 : vector<1x256xf32> to vector<8x256xf32>
    %22 = arith.mulf %20, %21 : vector<8x256xf32>
    %23 = arith.addf %12, %22 : vector<8x256xf32>
    %c0_12 = arith.constant 0 : index
    %c2 = arith.constant 2 : index
    %c0_13 = arith.constant 0 : index
    %24 = vector.load %arg0[%c0_12, %c2, %c0_13] : memref<8x8x256xf32, #tpu.memory_space<vmem>>, vector<8x1x256xf32>
    %25 = vector.shape_cast %24 : vector<8x1x256xf32> to vector<8x256xf32>
    %cst_14 = arith.constant dense<0.000000e+00> : vector<8xf32>
    %26 = vector.multi_reduction <add>, %25, %cst_14 [1] : vector<8x256xf32> to vector<8xf32>
    %27 = vector.shape_cast %26 : vector<8xf32> to vector<8x1xf32>
    %cst_15 = arith.constant 2.560000e+02 : f32
    %28 = vector.broadcast %cst_15 : f32 to vector<8x1xf32>
    %29 = arith.divf %27, %28 : vector<8x1xf32>
    %c2_16 = arith.constant 2 : index
    %c0_17 = arith.constant 0 : index
    %30 = vector.load %arg1[%c2_16, %c0_17] : memref<16x256xf32, #tpu.memory_space<vmem>>, vector<1x256xf32>
    %31 = vector.broadcast %29 : vector<8x1xf32> to vector<8x256xf32>
    %32 = vector.broadcast %30 : vector<1x256xf32> to vector<8x256xf32>
    %33 = arith.mulf %31, %32 : vector<8x256xf32>
    %34 = arith.addf %23, %33 : vector<8x256xf32>
    %c0_18 = arith.constant 0 : index
    %c3 = arith.constant 3 : index
    %c0_19 = arith.constant 0 : index
    %35 = vector.load %arg0[%c0_18, %c3, %c0_19] : memref<8x8x256xf32, #tpu.memory_space<vmem>>, vector<8x1x256xf32>
    %36 = vector.shape_cast %35 : vector<8x1x256xf32> to vector<8x256xf32>
    %cst_20 = arith.constant dense<0.000000e+00> : vector<8xf32>
    %37 = vector.multi_reduction <add>, %36, %cst_20 [1] : vector<8x256xf32> to vector<8xf32>
    %38 = vector.shape_cast %37 : vector<8xf32> to vector<8x1xf32>
    %cst_21 = arith.constant 2.560000e+02 : f32
    %39 = vector.broadcast %cst_21 : f32 to vector<8x1xf32>
    %40 = arith.divf %38, %39 : vector<8x1xf32>
    %c3_22 = arith.constant 3 : index
    %c0_23 = arith.constant 0 : index
    %41 = vector.load %arg1[%c3_22, %c0_23] : memref<16x256xf32, #tpu.memory_space<vmem>>, vector<1x256xf32>
    %42 = vector.broadcast %40 : vector<8x1xf32> to vector<8x256xf32>
    %43 = vector.broadcast %41 : vector<1x256xf32> to vector<8x256xf32>
    %44 = arith.mulf %42, %43 : vector<8x256xf32>
    %45 = arith.addf %34, %44 : vector<8x256xf32>
    %c0_24 = arith.constant 0 : index
    %c4 = arith.constant 4 : index
    %c0_25 = arith.constant 0 : index
    %46 = vector.load %arg0[%c0_24, %c4, %c0_25] : memref<8x8x256xf32, #tpu.memory_space<vmem>>, vector<8x1x256xf32>
    %47 = vector.shape_cast %46 : vector<8x1x256xf32> to vector<8x256xf32>
    %cst_26 = arith.constant dense<0.000000e+00> : vector<8xf32>
    %48 = vector.multi_reduction <add>, %47, %cst_26 [1] : vector<8x256xf32> to vector<8xf32>
    %49 = vector.shape_cast %48 : vector<8xf32> to vector<8x1xf32>
    %cst_27 = arith.constant 2.560000e+02 : f32
    %50 = vector.broadcast %cst_27 : f32 to vector<8x1xf32>
    %51 = arith.divf %49, %50 : vector<8x1xf32>
    %c4_28 = arith.constant 4 : index
    %c0_29 = arith.constant 0 : index
    %52 = vector.load %arg1[%c4_28, %c0_29] : memref<16x256xf32, #tpu.memory_space<vmem>>, vector<1x256xf32>
    %53 = vector.broadcast %51 : vector<8x1xf32> to vector<8x256xf32>
    %54 = vector.broadcast %52 : vector<1x256xf32> to vector<8x256xf32>
    %55 = arith.mulf %53, %54 : vector<8x256xf32>
    %56 = arith.addf %45, %55 : vector<8x256xf32>
    %c0_30 = arith.constant 0 : index
    %c5 = arith.constant 5 : index
    %c0_31 = arith.constant 0 : index
    %57 = vector.load %arg0[%c0_30, %c5, %c0_31] : memref<8x8x256xf32, #tpu.memory_space<vmem>>, vector<8x1x256xf32>
    %58 = vector.shape_cast %57 : vector<8x1x256xf32> to vector<8x256xf32>
    %cst_32 = arith.constant dense<0.000000e+00> : vector<8xf32>
    %59 = vector.multi_reduction <add>, %58, %cst_32 [1] : vector<8x256xf32> to vector<8xf32>
    %60 = vector.shape_cast %59 : vector<8xf32> to vector<8x1xf32>
    %cst_33 = arith.constant 2.560000e+02 : f32
    %61 = vector.broadcast %cst_33 : f32 to vector<8x1xf32>
    %62 = arith.divf %60, %61 : vector<8x1xf32>
    %c5_34 = arith.constant 5 : index
    %c0_35 = arith.constant 0 : index
    %63 = vector.load %arg1[%c5_34, %c0_35] : memref<16x256xf32, #tpu.memory_space<vmem>>, vector<1x256xf32>
    %64 = vector.broadcast %62 : vector<8x1xf32> to vector<8x256xf32>
    %65 = vector.broadcast %63 : vector<1x256xf32> to vector<8x256xf32>
    %66 = arith.mulf %64, %65 : vector<8x256xf32>
    %67 = arith.addf %56, %66 : vector<8x256xf32>
    %c0_36 = arith.constant 0 : index
    %c6 = arith.constant 6 : index
    %c0_37 = arith.constant 0 : index
    %68 = vector.load %arg0[%c0_36, %c6, %c0_37] : memref<8x8x256xf32, #tpu.memory_space<vmem>>, vector<8x1x256xf32>
    %69 = vector.shape_cast %68 : vector<8x1x256xf32> to vector<8x256xf32>
    %cst_38 = arith.constant dense<0.000000e+00> : vector<8xf32>
    %70 = vector.multi_reduction <add>, %69, %cst_38 [1] : vector<8x256xf32> to vector<8xf32>
    %71 = vector.shape_cast %70 : vector<8xf32> to vector<8x1xf32>
    %cst_39 = arith.constant 2.560000e+02 : f32
    %72 = vector.broadcast %cst_39 : f32 to vector<8x1xf32>
    %73 = arith.divf %71, %72 : vector<8x1xf32>
    %c6_40 = arith.constant 6 : index
    %c0_41 = arith.constant 0 : index
    %74 = vector.load %arg1[%c6_40, %c0_41] : memref<16x256xf32, #tpu.memory_space<vmem>>, vector<1x256xf32>
    %75 = vector.broadcast %73 : vector<8x1xf32> to vector<8x256xf32>
    %76 = vector.broadcast %74 : vector<1x256xf32> to vector<8x256xf32>
    %77 = arith.mulf %75, %76 : vector<8x256xf32>
    %78 = arith.addf %67, %77 : vector<8x256xf32>
    %c0_42 = arith.constant 0 : index
    %c7 = arith.constant 7 : index
    %c0_43 = arith.constant 0 : index
    %79 = vector.load %arg0[%c0_42, %c7, %c0_43] : memref<8x8x256xf32, #tpu.memory_space<vmem>>, vector<8x1x256xf32>
    %80 = vector.shape_cast %79 : vector<8x1x256xf32> to vector<8x256xf32>
    %cst_44 = arith.constant dense<0.000000e+00> : vector<8xf32>
    %81 = vector.multi_reduction <add>, %80, %cst_44 [1] : vector<8x256xf32> to vector<8xf32>
    %82 = vector.shape_cast %81 : vector<8xf32> to vector<8x1xf32>
    %cst_45 = arith.constant 2.560000e+02 : f32
    %83 = vector.broadcast %cst_45 : f32 to vector<8x1xf32>
    %84 = arith.divf %82, %83 : vector<8x1xf32>
    %c7_46 = arith.constant 7 : index
    %c0_47 = arith.constant 0 : index
    %85 = vector.load %arg1[%c7_46, %c0_47] : memref<16x256xf32, #tpu.memory_space<vmem>>, vector<1x256xf32>
    %86 = vector.broadcast %84 : vector<8x1xf32> to vector<8x256xf32>
    %87 = vector.broadcast %85 : vector<1x256xf32> to vector<8x256xf32>
    %88 = arith.mulf %86, %87 : vector<8x256xf32>
    %89 = arith.addf %78, %88 : vector<8x256xf32>
    %cst_48 = arith.constant dense<0.000000e+00> : vector<8xf32>
    %90 = vector.multi_reduction <add>, %89, %cst_48 [1] : vector<8x256xf32> to vector<8xf32>
    %91 = vector.shape_cast %90 : vector<8xf32> to vector<8x1xf32>
    %cst_49 = arith.constant 2.560000e+02 : f32
    %92 = vector.broadcast %cst_49 : f32 to vector<8x1xf32>
    %93 = arith.divf %91, %92 : vector<8x1xf32>
    %94 = vector.broadcast %93 : vector<8x1xf32> to vector<8x256xf32>
    %95 = arith.subf %89, %94 : vector<8x256xf32>
    %96 = arith.mulf %95, %95 : vector<8x256xf32>
    %cst_50 = arith.constant dense<0.000000e+00> : vector<8xf32>
    %97 = vector.multi_reduction <add>, %96, %cst_50 [1] : vector<8x256xf32> to vector<8xf32>
    %98 = vector.shape_cast %97 : vector<8xf32> to vector<8x1xf32>
    %cst_51 = arith.constant 2.560000e+02 : f32
    %99 = vector.broadcast %cst_51 : f32 to vector<8x1xf32>
    %100 = arith.divf %98, %99 : vector<8x1xf32>
    %cst_52 = arith.constant 9.99999974E-6 : f32
    %101 = vector.broadcast %cst_52 : f32 to vector<8x1xf32>
    %102 = arith.addf %100, %101 : vector<8x1xf32>
    %103 = math.rsqrt %102 : vector<8x1xf32>
    %104 = vector.broadcast %103 : vector<8x1xf32> to vector<8x256xf32>
    %105 = arith.mulf %95, %104 : vector<8x256xf32>
    %c9 = arith.constant 9 : index
    %c0_53 = arith.constant 0 : index
    %106 = vector.load %arg1[%c9, %c0_53] : memref<16x256xf32, #tpu.memory_space<vmem>>, vector<1x256xf32>
    %107 = vector.broadcast %106 : vector<1x256xf32> to vector<8x256xf32>
    %108 = arith.mulf %105, %107 : vector<8x256xf32>
    %c10 = arith.constant 10 : index
    %c0_54 = arith.constant 0 : index
    %109 = vector.load %arg1[%c10, %c0_54] : memref<16x256xf32, #tpu.memory_space<vmem>>, vector<1x256xf32>
    %110 = vector.broadcast %109 : vector<1x256xf32> to vector<8x256xf32>
    %111 = arith.addf %108, %110 : vector<8x256xf32>
    %cst_55 = arith.constant dense<0.000000e+00> : vector<256xf32>
    %112 = vector.multi_reduction <add>, %111, %cst_55 [0] : vector<8x256xf32> to vector<256xf32>
    %113 = vector.shape_cast %112 : vector<256xf32> to vector<1x256xf32>
    %cst_56 = arith.constant 8.000000e+00 : f32
    %114 = vector.broadcast %cst_56 : f32 to vector<1x256xf32>
    %115 = arith.divf %113, %114 : vector<1x256xf32>
    %116 = vector.broadcast %115 : vector<1x256xf32> to vector<8x256xf32>
    %117 = arith.subf %111, %116 : vector<8x256xf32>
    %118 = arith.mulf %117, %117 : vector<8x256xf32>
    %cst_57 = arith.constant dense<0.000000e+00> : vector<256xf32>
    %119 = vector.multi_reduction <add>, %118, %cst_57 [0] : vector<8x256xf32> to vector<256xf32>
    %120 = vector.shape_cast %119 : vector<256xf32> to vector<1x256xf32>
    %cst_58 = arith.constant 8.000000e+00 : f32
    %121 = vector.broadcast %cst_58 : f32 to vector<1x256xf32>
    %122 = arith.divf %120, %121 : vector<1x256xf32>
    %cst_59 = arith.constant 9.99999974E-6 : f32
    %123 = vector.broadcast %cst_59 : f32 to vector<1x256xf32>
    %124 = arith.addf %122, %123 : vector<1x256xf32>
    %125 = math.rsqrt %124 : vector<1x256xf32>
    %126 = vector.broadcast %125 : vector<1x256xf32> to vector<8x256xf32>
    %127 = arith.mulf %117, %126 : vector<8x256xf32>
    %c11 = arith.constant 11 : index
    %c0_60 = arith.constant 0 : index
    %128 = vector.load %arg1[%c11, %c0_60] : memref<16x256xf32, #tpu.memory_space<vmem>>, vector<1x256xf32>
    %129 = vector.broadcast %128 : vector<1x256xf32> to vector<8x256xf32>
    %130 = arith.mulf %127, %129 : vector<8x256xf32>
    %c12 = arith.constant 12 : index
    %c0_61 = arith.constant 0 : index
    %131 = vector.load %arg1[%c12, %c0_61] : memref<16x256xf32, #tpu.memory_space<vmem>>, vector<1x256xf32>
    %132 = vector.broadcast %131 : vector<1x256xf32> to vector<8x256xf32>
    %133 = arith.addf %130, %132 : vector<8x256xf32>
    %134 = arith.truncf %133 : vector<8x256xf32> to vector<8x256xbf16>
    %c0_62 = arith.constant 0 : index
    %c0_63 = arith.constant 0 : index
    %135 = vector.load %arg2[%c0_62, %c0_63] : memref<256x128xbf16, #tpu.memory_space<vmem>>, vector<256x128xbf16>
    %cst_64 = arith.constant dense<0.000000e+00> : vector<8x128xf32>
    %136 = tpu.matmul %134, %135, %cst_64 {dimension_numbers = #tpu.dot_dimension_numbers<[1], [0], [0], [1], [0, 0, 1, 1], [], []>} : vector<8x256xbf16>, vector<256x128xbf16>, vector<8x128xf32> -> vector<8x128xf32>
    %c13 = arith.constant 13 : index
    %c0_65 = arith.constant 0 : index
    %137 = vector.load %arg1[%c13, %c0_65] : memref<16x256xf32, #tpu.memory_space<vmem>>, vector<1x128xf32>
    %138 = vector.broadcast %137 : vector<1x128xf32> to vector<8x128xf32>
    %139 = arith.addf %136, %138 : vector<8x128xf32>
    %140 = arith.mulf %139, %139 : vector<8x128xf32>
    %cst_66 = arith.constant dense<0.000000e+00> : vector<8xf32>
    %141 = vector.multi_reduction <add>, %140, %cst_66 [1] : vector<8x128xf32> to vector<8xf32>
    %142 = vector.shape_cast %141 : vector<8xf32> to vector<8x1xf32>
    %cst_67 = arith.constant 9.99999996E-13 : f32
    %143 = vector.broadcast %cst_67 : f32 to vector<8x1xf32>
    %144 = arith.addf %142, %143 : vector<8x1xf32>
    %145 = math.rsqrt %144 : vector<8x1xf32>
    %146 = vector.broadcast %145 : vector<8x1xf32> to vector<8x128xf32>
    %147 = arith.mulf %139, %146 : vector<8x128xf32>
    %148 = arith.truncf %147 : vector<8x128xf32> to vector<8x128xbf16>
    %c0_68 = arith.constant 0 : index
    %c0_69 = arith.constant 0 : index
    %149 = vector.load %arg3[%c0_68, %c0_69] : memref<128x128xbf16, #tpu.memory_space<vmem>>, vector<128x128xbf16>
    %cst_70 = arith.constant dense<0.000000e+00> : vector<8x128xf32>
    %150 = tpu.matmul %148, %149, %cst_70 {dimension_numbers = #tpu.dot_dimension_numbers<[1], [0], [0], [1], [0, 0, 1, 1], [], []>} : vector<8x128xbf16>, vector<128x128xbf16>, vector<8x128xf32> -> vector<8x128xf32>
    %151 = tpu.iota {dimensions = array<i32: 1>} : vector<8x128xi32>
    %152 = tpu.iota {dimensions = array<i32: 0>} : vector<8x128xi32>
    %cst_71 = arith.constant 0.000000e+00 : f32
    %153 = vector.broadcast %cst_71 : f32 to vector<8x128xf32>
    %c0_i32 = arith.constant 0 : i32
    %154 = vector.broadcast %c0_i32 : i32 to vector<8x128xi32>
    %155 = arith.cmpi eq, %152, %154 : vector<8x128xi32>
    %c0_72 = arith.constant 0 : index
    %156 = memref.load %arg4[%c0_72] : memref<8xi32, #tpu.memory_space<smem>>
    %157 = vector.broadcast %156 : i32 to vector<8x128xi32>
    %158 = arith.cmpi eq, %151, %157 : vector<8x128xi32>
    %159 = arith.andi %155, %158 : vector<8x128xi1>
    %cst_73 = arith.constant 1.000000e+00 : f32
    %160 = vector.broadcast %cst_73 : f32 to vector<8x128xf32>
    %161 = arith.select %159, %160, %153 : vector<8x128xi1>, vector<8x128xf32>
    %c1_i32 = arith.constant 1 : i32
    %162 = vector.broadcast %c1_i32 : i32 to vector<8x128xi32>
    %163 = arith.cmpi eq, %152, %162 : vector<8x128xi32>
    %c1_74 = arith.constant 1 : index
    %164 = memref.load %arg4[%c1_74] : memref<8xi32, #tpu.memory_space<smem>>
    %165 = vector.broadcast %164 : i32 to vector<8x128xi32>
    %166 = arith.cmpi eq, %151, %165 : vector<8x128xi32>
    %167 = arith.andi %163, %166 : vector<8x128xi1>
    %cst_75 = arith.constant 1.000000e+00 : f32
    %168 = vector.broadcast %cst_75 : f32 to vector<8x128xf32>
    %169 = arith.select %167, %168, %161 : vector<8x128xi1>, vector<8x128xf32>
    %c2_i32 = arith.constant 2 : i32
    %170 = vector.broadcast %c2_i32 : i32 to vector<8x128xi32>
    %171 = arith.cmpi eq, %152, %170 : vector<8x128xi32>
    %c2_76 = arith.constant 2 : index
    %172 = memref.load %arg4[%c2_76] : memref<8xi32, #tpu.memory_space<smem>>
    %173 = vector.broadcast %172 : i32 to vector<8x128xi32>
    %174 = arith.cmpi eq, %151, %173 : vector<8x128xi32>
    %175 = arith.andi %171, %174 : vector<8x128xi1>
    %cst_77 = arith.constant 1.000000e+00 : f32
    %176 = vector.broadcast %cst_77 : f32 to vector<8x128xf32>
    %177 = arith.select %175, %176, %169 : vector<8x128xi1>, vector<8x128xf32>
    %c3_i32 = arith.constant 3 : i32
    %178 = vector.broadcast %c3_i32 : i32 to vector<8x128xi32>
    %179 = arith.cmpi eq, %152, %178 : vector<8x128xi32>
    %c3_78 = arith.constant 3 : index
    %180 = memref.load %arg4[%c3_78] : memref<8xi32, #tpu.memory_space<smem>>
    %181 = vector.broadcast %180 : i32 to vector<8x128xi32>
    %182 = arith.cmpi eq, %151, %181 : vector<8x128xi32>
    %183 = arith.andi %179, %182 : vector<8x128xi1>
    %cst_79 = arith.constant 1.000000e+00 : f32
    %184 = vector.broadcast %cst_79 : f32 to vector<8x128xf32>
    %185 = arith.select %183, %184, %177 : vector<8x128xi1>, vector<8x128xf32>
    %c4_i32 = arith.constant 4 : i32
    %186 = vector.broadcast %c4_i32 : i32 to vector<8x128xi32>
    %187 = arith.cmpi eq, %152, %186 : vector<8x128xi32>
    %c4_80 = arith.constant 4 : index
    %188 = memref.load %arg4[%c4_80] : memref<8xi32, #tpu.memory_space<smem>>
    %189 = vector.broadcast %188 : i32 to vector<8x128xi32>
    %190 = arith.cmpi eq, %151, %189 : vector<8x128xi32>
    %191 = arith.andi %187, %190 : vector<8x128xi1>
    %cst_81 = arith.constant 1.000000e+00 : f32
    %192 = vector.broadcast %cst_81 : f32 to vector<8x128xf32>
    %193 = arith.select %191, %192, %185 : vector<8x128xi1>, vector<8x128xf32>
    %c5_i32 = arith.constant 5 : i32
    %194 = vector.broadcast %c5_i32 : i32 to vector<8x128xi32>
    %195 = arith.cmpi eq, %152, %194 : vector<8x128xi32>
    %c5_82 = arith.constant 5 : index
    %196 = memref.load %arg4[%c5_82] : memref<8xi32, #tpu.memory_space<smem>>
    %197 = vector.broadcast %196 : i32 to vector<8x128xi32>
    %198 = arith.cmpi eq, %151, %197 : vector<8x128xi32>
    %199 = arith.andi %195, %198 : vector<8x128xi1>
    %cst_83 = arith.constant 1.000000e+00 : f32
    %200 = vector.broadcast %cst_83 : f32 to vector<8x128xf32>
    %201 = arith.select %199, %200, %193 : vector<8x128xi1>, vector<8x128xf32>
    %c6_i32 = arith.constant 6 : i32
    %202 = vector.broadcast %c6_i32 : i32 to vector<8x128xi32>
    %203 = arith.cmpi eq, %152, %202 : vector<8x128xi32>
    %c6_84 = arith.constant 6 : index
    %204 = memref.load %arg4[%c6_84] : memref<8xi32, #tpu.memory_space<smem>>
    %205 = vector.broadcast %204 : i32 to vector<8x128xi32>
    %206 = arith.cmpi eq, %151, %205 : vector<8x128xi32>
    %207 = arith.andi %203, %206 : vector<8x128xi1>
    %cst_85 = arith.constant 1.000000e+00 : f32
    %208 = vector.broadcast %cst_85 : f32 to vector<8x128xf32>
    %209 = arith.select %207, %208, %201 : vector<8x128xi1>, vector<8x128xf32>
    %c7_i32 = arith.constant 7 : i32
    %210 = vector.broadcast %c7_i32 : i32 to vector<8x128xi32>
    %211 = arith.cmpi eq, %152, %210 : vector<8x128xi32>
    %c7_86 = arith.constant 7 : index
    %212 = memref.load %arg4[%c7_86] : memref<8xi32, #tpu.memory_space<smem>>
    %213 = vector.broadcast %212 : i32 to vector<8x128xi32>
    %214 = arith.cmpi eq, %151, %213 : vector<8x128xi32>
    %215 = arith.andi %211, %214 : vector<8x128xi1>
    %cst_87 = arith.constant 1.000000e+00 : f32
    %216 = vector.broadcast %cst_87 : f32 to vector<8x128xf32>
    %217 = arith.select %215, %216, %209 : vector<8x128xi1>, vector<8x128xf32>
    %c100_i32 = arith.constant 100 : i32
    %218 = vector.broadcast %c100_i32 : i32 to vector<8x128xi32>
    %219 = arith.cmpi slt, %151, %218 : vector<8x128xi32>
    %220 = arith.extui %219 : vector<8x128xi1> to vector<8x128xi32>
    %221 = arith.sitofp %220 : vector<8x128xi32> to vector<8x128xf32>
    %222 = arith.subf %221, %217 : vector<8x128xf32>
    %cst_88 = arith.constant 3.200000e+01 : f32
    %223 = vector.broadcast %cst_88 : f32 to vector<8x128xf32>
    %224 = arith.mulf %223, %150 : vector<8x128xf32>
    %225 = math.exp %224 : vector<8x128xf32>
    %226 = tpu.reciprocal %225 {approx = true} : vector<8x128xf32> -> vector<8x128xf32>
    %cst_89 = arith.constant 24.5325298 : f32
    %227 = vector.broadcast %cst_89 : f32 to vector<8x128xf32>
    %228 = arith.mulf %227, %226 : vector<8x128xf32>
    %cst_90 = arith.constant 24.5325298 : f32
    %229 = vector.broadcast %cst_90 : f32 to vector<8x128xf32>
    %230 = arith.mulf %229, %225 : vector<8x128xf32>
    %cst_91 = arith.constant 0.000000e+00 : f32
    %231 = vector.broadcast %cst_91 : f32 to vector<8x128xf32>
    %232 = arith.cmpf ogt, %217, %231 : vector<8x128xf32>
    %cst_92 = arith.constant 0.000000e+00 : f32
    %233 = vector.broadcast %cst_92 : f32 to vector<8x128xf32>
    %234 = arith.select %232, %228, %233 : vector<8x128xi1>, vector<8x128xf32>
    %cst_93 = arith.constant dense<0.000000e+00> : vector<128xf32>
    %235 = vector.multi_reduction <add>, %234, %cst_93 [0] : vector<8x128xf32> to vector<128xf32>
    %236 = vector.shape_cast %235 : vector<128xf32> to vector<1x128xf32>
    %cst_94 = arith.constant 0.000000e+00 : f32
    %237 = vector.broadcast %cst_94 : f32 to vector<8x128xf32>
    %238 = arith.cmpf ogt, %222, %237 : vector<8x128xf32>
    %cst_95 = arith.constant 0.000000e+00 : f32
    %239 = vector.broadcast %cst_95 : f32 to vector<8x128xf32>
    %240 = arith.select %238, %230, %239 : vector<8x128xi1>, vector<8x128xf32>
    %cst_96 = arith.constant dense<0.000000e+00> : vector<128xf32>
    %241 = vector.multi_reduction <add>, %240, %cst_96 [0] : vector<8x128xf32> to vector<128xf32>
    %242 = vector.shape_cast %241 : vector<128xf32> to vector<1x128xf32>
    %cst_97 = arith.constant dense<0.000000e+00> : vector<128xf32>
    %243 = vector.multi_reduction <add>, %217, %cst_97 [0] : vector<8x128xf32> to vector<128xf32>
    %244 = vector.shape_cast %243 : vector<128xf32> to vector<1x128xf32>
    %cst_98 = arith.constant 0.000000e+00 : f32
    %245 = vector.broadcast %cst_98 : f32 to vector<1x128xf32>
    %246 = arith.cmpf ogt, %244, %245 : vector<1x128xf32>
    %247 = arith.extui %246 : vector<1x128xi1> to vector<1x128xi32>
    %248 = arith.sitofp %247 : vector<1x128xi32> to vector<1x128xf32>
    %249 = vector.shape_cast %248 : vector<1x128xf32> to vector<1x1x128xf32>
    %cst_99 = arith.constant dense<0.000000e+00> : vector<1xf32>
    %250 = vector.multi_reduction <add>, %249, %cst_99 [1, 2] : vector<1x1x128xf32> to vector<1xf32>
    %251 = vector.shape_cast %250 : vector<1xf32> to vector<1x1x1xf32>
    %252 = vector.extract %251[0, 0, 0] : f32 from vector<1x1x1xf32>
    %253 = vector.broadcast %252 : f32 to vector<1x1xf32>
    %254 = math.log1p %236 : vector<1x128xf32>
    %255 = vector.shape_cast %254 : vector<1x128xf32> to vector<1x1x128xf32>
    %cst_100 = arith.constant dense<0.000000e+00> : vector<1xf32>
    %256 = vector.multi_reduction <add>, %255, %cst_100 [1, 2] : vector<1x1x128xf32> to vector<1xf32>
    %257 = vector.shape_cast %256 : vector<1xf32> to vector<1x1x1xf32>
    %258 = vector.extract %257[0, 0, 0] : f32 from vector<1x1x1xf32>
    %259 = vector.broadcast %258 : f32 to vector<1x1xf32>
    %260 = tpu.reciprocal %253 {approx = true} : vector<1x1xf32> -> vector<1x1xf32>
    %261 = arith.mulf %259, %260 : vector<1x1xf32>
    %262 = math.log1p %242 : vector<1x128xf32>
    %263 = vector.shape_cast %262 : vector<1x128xf32> to vector<1x1x128xf32>
    %cst_101 = arith.constant dense<0.000000e+00> : vector<1xf32>
    %264 = vector.multi_reduction <add>, %263, %cst_101 [1, 2] : vector<1x1x128xf32> to vector<1xf32>
    %265 = vector.shape_cast %264 : vector<1xf32> to vector<1x1x1xf32>
    %266 = vector.extract %265[0, 0, 0] : f32 from vector<1x1x1xf32>
    %267 = vector.broadcast %266 : f32 to vector<1x1xf32>
    %cst_102 = arith.constant 0.00999999977 : f32
    %268 = vector.broadcast %cst_102 : f32 to vector<1x1xf32>
    %269 = arith.mulf %267, %268 : vector<1x1xf32>
    %270 = arith.addf %261, %269 : vector<1x1xf32>
    %c0_103 = arith.constant 0 : index
    %c0_104 = arith.constant 0 : index
    %271 = vector.load %arg5[%c0_103, %c0_104] : memref<1x1xf32, #tpu.memory_space<vmem>>, vector<1x1xf32>
    tpu.vector_store %arg5[%c0_103, %c0_104], %270 {strides = array<i32>} : memref<1x1xf32, #tpu.memory_space<vmem>>, vector<1x1xf32>,
    return
  }
}

</mosaic_0001>

<bundles_post_ra>
// kernel: metric_model_forward.1
= control target key start
LH: loop header
LB: loop body
LE: loop exit
PB: predicated region body
PF: predicated region fallthrough
CT: control target
= control target key end

     0   :  { %10 = vsyncpa [#allocation4], 0  ;;  %s2246_s0 = inlined_call_operand.vmem [shape: f32[8,8,256], index: 0, kind: input, shape index: {}]   ;;  %s2247_s1 = inlined_call_operand.vmem [shape: f32[16,256], index: 1, kind: input, shape index: {}]   ;;  %s2248_s2 = inlined_call_operand.vmem [shape: bf16[256,128], index: 2, kind: input, shape index: {}]   ;;  %s2249_s3 = inlined_call_operand.vmem [shape: bf16[128,128], index: 3, kind: input, shape index: {}]   ;;  %s2250_s4 = inlined_call_operand.vmem [shape: s32[8], index: 4, kind: input, shape index: {}]   ;;  %s2251_s5 = inlined_call_operand.hbm [shape: f32[1,1], index: 5, kind: output, shape index: {}]  }
   0x1   :  { %11 = vsyncpa [#allocation3], 0  ;;  %s26_s20 = sshll.u32 %s2250_s4, 4  ;;  %s27_s20 = int_to_ptr.vmem [resolvable:$true] %s26_s20 }
   0x2   :  { %s1720_s21 = scalar_lea.vmem %s27_s20, 16  ;;  %p1725_p1 = scmp.lt.s32.totalorder %s27_s20, %s27_s20 }
   0x3   :  { %p1721_p0 = scmp.ne.s32.totalorder %s27_s20, %s1720_s21  ;;  %p1726_p2 = scmp.lt.s32.totalorder %s1720_s21, %s1720_s21 }
   0x5   :  { %p1727_p3 = por %p1726_p2, %p1725_p1 }
   0x7   :  { %p1728_p4 = pnand %p1727_p3, %p1721_p0 }
   0x9   :  { %1731 = shalt.err (!%p1728_p4)
}
   0xa   :  { %s1758_s22 = smov [#allocation2]  }
   0xb   :  { %29 = dma.vmem_to_smem %s27_s20, 16, %s1758_s22, [#allocation4]  }
   0xc   :  { %1754 = dma.done.wait [#allocation4], 16  }
   0xd   :  { %1755 = vsyncadd [#allocation4], 4294967280 }
   0xe   :  { %33 = sfence }
   0xf   :  { %v67_v0 = vlaneseq  ;;  %v37_v1 = vld [vmem:[%s2246_s0] ss:$8 sm:$0x3]  ;;  %v1509_v2 = vld [vmem:[%s2246_s0 + $0x10] ss:$8 sm:$0x3] }
  0x10   :  { %v1510_v3 = vld [vmem:[%s2246_s0 + $0x20] ss:$8 sm:$0x3]  ;;  %v1511_v4 = vld [vmem:[%s2246_s0 + $0x30] ss:$8 sm:$0x3]  ;;  %v60_v15 = vcombine.low %v37_v1, %v1509_v2 }
  0x11   :  { %v1512_v5 = vld [vmem:[%s2246_s0 + $0x40] ss:$8 sm:$0x3]  ;;  %v1513_v6 = vld [vmem:[%s2246_s0 + $0x50] ss:$8 sm:$0x3]  ;;  %v61_v18 = vcombine.low %v1510_v3, %v1511_v4 }
  0x12   :  { %v1514_v7 = vld [vmem:[%s2246_s0 + $0x60] ss:$8 sm:$0x3]  ;;  %v1515_v8 = vld [vmem:[%s2246_s0 + $0x70] ss:$8 sm:$0x3]  ;;  %v62_v19 = vcombine.low %v1512_v5, %v1513_v6 }
  0x13   :  { %v1821_v9 = vshrl.u32 %v67_v0, 7  ;;  %v1525_v10 = vld [vmem:[%s2246_s0 + $0x2] ss:$8 sm:$0x3]  ;;  %v1759_v11 = vmov 1966171168   ;;  %v63_v20 = vcombine.low %v1514_v7, %v1515_v8 }
  0x14   :  { %v65_v12 = vunpack.c.l.s4 %v1759_v11  ;;  %v1526_v13 = vld [vmem:[%s2246_s0 + $0x12] ss:$8 sm:$0x3]  ;;  %v1527_v14 = vld [vmem:[%s2246_s0 + $0x22] ss:$8 sm:$0x3] }
  0x15   :  { %v1528_v16 = vld [vmem:[%s2246_s0 + $0x32] ss:$8 sm:$0x3]  ;;  %v1529_v17 = vld [vmem:[%s2246_s0 + $0x42] ss:$8 sm:$0x3]  ;;  %v297_v25 = vcombine.low %v1525_v10, %v1526_v13 }
  0x16   :  { %v66_v21 = vunpack.c.0.s8 %v65_v12  ;;  %v1530_v22 = vld [vmem:[%s2246_s0 + $0x52] ss:$8 sm:$0x3]  ;;  %v1531_v23 = vld [vmem:[%s2246_s0 + $0x62] ss:$8 sm:$0x3]  ;;  %v298_v26 = vcombine.low %v1527_v14, %v1528_v16 }
  0x17   :  { %v1532_v24 = vld [vmem:[%s2246_s0 + $0x72] ss:$8 sm:$0x3]  ;;  %v299_v27 = vcombine.low %v1529_v17, %v1530_v22  ;;  %v1516_v28 = vld [vmem:[%s2246_s0 + $0x1] ss:$8 sm:$0x3] }
  0x18   :  { %v1851_v29 = vsub.s32 %v66_v21, %v1821_v9  ;;  %v300_v30 = vcombine.low %v1531_v23, %v1532_v24  ;;  %v1517_v31 = vld [vmem:[%s2246_s0 + $0x11] ss:$8 sm:$0x3]  ;;  %v1518_v41 = vld [vmem:[%s2246_s0 + $0x21] ss:$8 sm:$0x3] }
  0x19   :  { %v184_v32 = vcombine.low %v1516_v28, %v1517_v31  ;;  %v1519_v42 = vld [vmem:[%s2246_s0 + $0x31] ss:$8 sm:$0x3]  ;;  %v1520_v47 = vld [vmem:[%s2246_s0 + $0x41] ss:$8 sm:$0x3] }
  0x1a   :  { %v70_v33 = vrot.slane %v60_v15, %v1851_v29  ;;  %v77_v34 = vrot.slane %v61_v18, %v1851_v29  ;;  %v84_v35 = vrot.slane %v62_v19, %v1851_v29  ;;  %v91_v36 = vrot.slane %v63_v20, %v1851_v29  ;;  %v1521_v48 = vld [vmem:[%s2246_s0 + $0x51] ss:$8 sm:$0x3]  ;;  %v1522_v53 = vld [vmem:[%s2246_s0 + $0x61] ss:$8 sm:$0x3] }
  0x1b   :  { %v307_v37 = vrot.slane %v297_v25, %v1851_v29  ;;  %v314_v38 = vrot.slane %v298_v26, %v1851_v29  ;;  %v321_v39 = vrot.slane %v299_v27, %v1851_v29  ;;  %v328_v40 = vrot.slane %v300_v30, %v1851_v29  ;;  %v1523_v54 = vld [vmem:[%s2246_s0 + $0x71] ss:$8 sm:$0x3]  ;;  %v1534_v59 = vld [vmem:[%s2246_s0 + $0x3] ss:$8 sm:$0x3] }
  0x1c   :  { %v92_v43 = vcombine.low %v70_v33, %v77_v34  ;;  %v93_v44 = vcombine.high %v70_v33, %v77_v34  ;;  %v94_v45 = vcombine.low %v84_v35, %v91_v36  ;;  %v95_v46 = vcombine.high %v84_v35, %v91_v36  ;;  %v1535_v60 = vld [vmem:[%s2246_s0 + $0x13] ss:$8 sm:$0x3]  ;;  %v1536_v2 = vld [vmem:[%s2246_s0 + $0x23] ss:$8 sm:$0x3] }
  0x1d   :  { %v329_v49 = vcombine.low %v307_v37, %v314_v38  ;;  %v330_v50 = vcombine.high %v307_v37, %v314_v38  ;;  %v331_v51 = vcombine.low %v321_v39, %v328_v40  ;;  %v332_v52 = vcombine.high %v321_v39, %v328_v40  ;;  %v1537_v3 = vld [vmem:[%s2246_s0 + $0x33] ss:$8 sm:$0x3]  ;;  %v1538_v8 = vld [vmem:[%s2246_s0 + $0x43] ss:$8 sm:$0x3] }
  0x1e   :  { %v102_v55 = vrot.slane %v92_v43, %v1851_v29  ;;  %v109_v56 = vrot.slane %v93_v44, %v1851_v29  ;;  %v116_v57 = vrot.slane %v94_v45, %v1851_v29  ;;  %v123_v58 = vrot.slane %v95_v46, %v1851_v29  ;;  %v1539_v10 = vld [vmem:[%s2246_s0 + $0x53] ss:$8 sm:$0x3]  ;;  %v1540_v15 = vld [vmem:[%s2246_s0 + $0x63] ss:$8 sm:$0x3] }
  0x1f   :  { %v339_v61 = vrot.slane %v329_v49, %v1851_v29  ;;  %v346_v62 = vrot.slane %v330_v50, %v1851_v29  ;;  %v353_v63 = vrot.slane %v331_v51, %v1851_v29  ;;  %v360_v1 = vrot.slane %v332_v52, %v1851_v29  ;;  %v1541_v16 = vld [vmem:[%s2246_s0 + $0x73] ss:$8 sm:$0x3]  ;;  %v1543_v25 = vld [vmem:[%s2246_s0 + $0x4] ss:$8 sm:$0x3] }
  0x20   :  { %v124_v4 = vcombine.low %v102_v55, %v116_v57  ;;  %v125_v5 = vcombine.low %v109_v56, %v123_v58  ;;  %v185_v6 = vcombine.low %v1518_v41, %v1519_v42  ;;  %v186_v7 = vcombine.low %v1520_v47, %v1521_v48  ;;  %v1544_v26 = vld [vmem:[%s2246_s0 + $0x14] ss:$8 sm:$0x3]  ;;  %v1547_v38 = vld [vmem:[%s2246_s0 + $0x44] ss:$8 sm:$0x3] }
  0x21   :  { %v361_v11 = vcombine.low %v339_v61, %v353_v63  ;;  %v362_v12 = vcombine.low %v346_v62, %v360_v1  ;;  %v187_v13 = vcombine.low %v1522_v53, %v1523_v54  ;;  %v194_v14 = vrot.slane %v184_v32, %v1851_v29  ;;  %v1545_v32 = vld [vmem:[%s2246_s0 + $0x24] ss:$8 sm:$0x3]  ;;  %v1546_v33 = vld [vmem:[%s2246_s0 + $0x34] ss:$8 sm:$0x3] }
  0x22   :  { %v128_v17 = vadd.f32 %v125_v5, %v124_v4  ;;  %v201_v18 = vrot.slane %v185_v6, %v1851_v29  ;;  %v208_v19 = vrot.slane %v186_v7, %v1851_v29  ;;  %v410_v20 = vcombine.low %v1534_v59, %v1535_v60  ;;  %v1548_v39 = vld [vmem:[%s2246_s0 + $0x54] ss:$8 sm:$0x3]  ;;  %v1549_v43 = vld [vmem:[%s2246_s0 + $0x64] ss:$8 sm:$0x3] }
  0x23   :  { %v365_v21 = vadd.f32 %v362_v12, %v361_v11  ;;  %v215_v22 = vrot.slane %v187_v13, %v1851_v29  ;;  %v411_v23 = vcombine.low %v1536_v2, %v1537_v3  ;;  %v412_v24 = vcombine.low %v1538_v8, %v1539_v10  ;;  %v1550_v44 = vld [vmem:[%s2246_s0 + $0x74] ss:$8 sm:$0x3]  ;;  %v1552_v50 = vld [vmem:[%s2246_s0 + $0x5] ss:$8 sm:$0x3] }
  0x24   :  { %129 = vadd.xlane.f32.xlu0 %v128_v17  ;;  %v216_v27 = vcombine.low %v194_v14, %v201_v18  ;;  %v217_v28 = vcombine.high %v194_v14, %v201_v18  ;;  %v413_v30 = vcombine.low %v1540_v15, %v1541_v16  ;;  %v420_v31 = vrot.slane %v410_v20, %v1851_v29  ;;  %v1553_v51 = vld [vmem:[%s2246_s0 + $0x15] ss:$8 sm:$0x3]  ;;  %v1554_v56 = vld [vmem:[%s2246_s0 + $0x25] ss:$8 sm:$0x3] }
  0x25   :  { %366 = vadd.xlane.f32.xlu1 %v365_v21  ;;  %v218_v34 = vcombine.low %v208_v19, %v215_v22  ;;  %v219_v35 = vcombine.high %v208_v19, %v215_v22  ;;  %v427_v36 = vrot.slane %v411_v23, %v1851_v29  ;;  %v434_v37 = vrot.slane %v412_v24, %v1851_v29  ;;  %v1555_v57 = vld [vmem:[%s2246_s0 + $0x35] ss:$8 sm:$0x3]  ;;  %v1556_v62 = vld [vmem:[%s2246_s0 + $0x45] ss:$8 sm:$0x3] }
  0x26   :  { %v226_v40 = vrot.slane %v216_v27, %v1851_v29  ;;  %v233_v41 = vrot.slane %v217_v28, %v1851_v29  ;;  %v441_v42 = vrot.slane %v413_v30, %v1851_v29  ;;  %v523_v45 = vcombine.low %v1543_v25, %v1544_v26  ;;  %v1557_v63 = vld [vmem:[%s2246_s0 + $0x55] ss:$8 sm:$0x3]  ;;  %v1558_v5 = vld [vmem:[%s2246_s0 + $0x65] ss:$8 sm:$0x3] }
  0x27   :  { %v240_v46 = vrot.slane %v218_v34, %v1851_v29  ;;  %v247_v47 = vrot.slane %v219_v35, %v1851_v29  ;;  %v442_v48 = vcombine.low %v420_v31, %v427_v36  ;;  %v443_v49 = vcombine.high %v420_v31, %v427_v36  ;;  %v1559_v6 = vld [vmem:[%s2246_s0 + $0x75] ss:$8 sm:$0x3]  ;;  %v1561_v16 = vld [vmem:[%s2246_s0 + $0x6] ss:$8 sm:$0x3] }
  0x28   :  { %v444_v52 = vcombine.low %v434_v37, %v441_v42  ;;  %v445_v53 = vcombine.high %v434_v37, %v441_v42  ;;  %v524_v54 = vcombine.low %v1545_v32, %v1546_v33  ;;  %v525_v55 = vcombine.low %v1547_v38, %v1548_v39  ;;  %v1562_v17 = vld [vmem:[%s2246_s0 + $0x16] ss:$8 sm:$0x3]  ;;  %v1563_v22 = vld [vmem:[%s2246_s0 + $0x26] ss:$8 sm:$0x3] }
  0x29   :  { %v248_v58 = vcombine.low %v226_v40, %v240_v46  ;;  %v249_v59 = vcombine.low %v233_v41, %v247_v47  ;;  %v452_v60 = vrot.slane %v442_v48, %v1851_v29  ;;  %v459_v61 = vrot.slane %v443_v49, %v1851_v29  ;;  %v1564_v23 = vld [vmem:[%s2246_s0 + $0x36] ss:$8 sm:$0x3]  ;;  %v1565_v28 = vld [vmem:[%s2246_s0 + $0x46] ss:$8 sm:$0x3] }
  0x2a   :  { %v466_v1 = vrot.slane %v444_v52, %v1851_v29  ;;  %v473_v2 = vrot.slane %v445_v53, %v1851_v29  ;;  %v526_v3 = vcombine.low %v1549_v43, %v1550_v44  ;;  %v533_v4 = vrot.slane %v523_v45, %v1851_v29  ;;  %v1566_v30 = vld [vmem:[%s2246_s0 + $0x56] ss:$8 sm:$0x3]  ;;  %v1567_v35 = vld [vmem:[%s2246_s0 + $0x66] ss:$8 sm:$0x3] }
  0x2b   :  { %v252_v7 = vadd.f32 %v249_v59, %v248_v58  ;;  %v540_v8 = vrot.slane %v524_v54, %v1851_v29  ;;  %v547_v10 = vrot.slane %v525_v55, %v1851_v29  ;;  %v636_v11 = vcombine.low %v1552_v50, %v1553_v51  ;;  %v1568_v36 = vld [vmem:[%s2246_s0 + $0x76] ss:$8 sm:$0x3]  ;;  %v1570_v41 = vld [vmem:[%s2246_s0 + $0x7] ss:$8 sm:$0x3] }
  0x2c   :  { %v474_v12 = vcombine.low %v452_v60, %v466_v1  ;;  %v475_v13 = vcombine.low %v459_v61, %v473_v2  ;;  %v554_v14 = vrot.slane %v526_v3, %v1851_v29  ;;  %v637_v15 = vcombine.low %v1554_v56, %v1555_v57  ;;  %v1571_v42 = vld [vmem:[%s2246_s0 + $0x17] ss:$8 sm:$0x3]  ;;  %v1572_v43 = vld [vmem:[%s2246_s0 + $0x27] ss:$8 sm:$0x3] }
  0x2d   :  { %253 = vadd.xlane.f32.xlu0 %v252_v7  ;;  %v555_v18 = vcombine.low %v533_v4, %v540_v8  ;;  %v556_v19 = vcombine.high %v533_v4, %v540_v8  ;;  %v638_v20 = vcombine.low %v1556_v62, %v1557_v63  ;;  %v639_v21 = vcombine.low %v1558_v5, %v1559_v6  ;;  %v1573_v48 = vld [vmem:[%s2246_s0 + $0x37] ss:$8 sm:$0x3]  ;;  %v1574_v53 = vld [vmem:[%s2246_s0 + $0x47] ss:$8 sm:$0x3] }
  0x2e   :  { %v478_v24 = vadd.f32 %v475_v13, %v474_v12  ;;  %v557_v25 = vcombine.low %v547_v10, %v554_v14  ;;  %v558_v26 = vcombine.high %v547_v10, %v554_v14  ;;  %v646_v27 = vrot.slane %v636_v11, %v1851_v29  ;;  %v1575_v54 = vld [vmem:[%s2246_s0 + $0x57] ss:$8 sm:$0x3]  ;;  %v1576_v55 = vld [vmem:[%s2246_s0 + $0x67] ss:$8 sm:$0x3] }
  0x2f   :  { %v565_v31 = vrot.slane %v555_v18, %v1851_v29  ;;  %v572_v32 = vrot.slane %v556_v19, %v1851_v29  ;;  %v653_v33 = vrot.slane %v637_v15, %v1851_v29  ;;  %v660_v34 = vrot.slane %v638_v20, %v1851_v29  ;;  %v1577_v56 = vld [vmem:[%s2246_s0 + $0x77] ss:$8 sm:$0x3]  ;;  %s1353_s14 = sld [smem:[#allocation2]]  ;;  %s1607_s15 = sld [smem:[#allocation2 + $0x1]] }
  0x30   :  { %479 = vadd.xlane.f32.xlu1 %v478_v24  ;;  %v579_v37 = vrot.slane %v557_v25, %v1851_v29  ;;  %v586_v38 = vrot.slane %v558_v26, %v1851_v29  ;;  %v667_v39 = vrot.slane %v639_v21, %v1851_v29  ;;  %v749_v40 = vcombine.low %v1561_v16, %v1562_v17  ;;  %s1608_s16 = sld [smem:[#allocation2 + $0x2]]  ;;  %s1609_s17 = sld [smem:[#allocation2 + $0x3]] }
  0x31   :  { %v668_v44 = vcombine.low %v646_v27, %v653_v33  ;;  %v669_v45 = vcombine.high %v646_v27, %v653_v33  ;;  %v750_v46 = vcombine.low %v1563_v22, %v1564_v23  ;;  %v751_v47 = vcombine.low %v1565_v28, %v1566_v30  ;;  %s1610_s18 = sld [smem:[#allocation2 + $0x4]]  ;;  %s1611_s19 = sld [smem:[#allocation2 + $0x5]] }
  0x32   :  { %v587_v49 = vcombine.low %v565_v31, %v579_v37  ;;  %v588_v50 = vcombine.low %v572_v32, %v586_v38  ;;  %v670_v51 = vcombine.low %v660_v34, %v667_v39  ;;  %v671_v52 = vcombine.high %v660_v34, %v667_v39  ;;  %s2217_s20 = sld [smem:[#allocation2 + $0x7]]  ;;  %s1762_s22 = smov [#allocation5]  }
  0x33   :  { %v678_v57 = vrot.slane %v668_v44, %v1851_v29  ;;  %v685_v58 = vrot.slane %v669_v45, %v1851_v29  ;;  %v752_v59 = vcombine.low %v1567_v35, %v1568_v36  ;;  %v759_v60 = vrot.slane %v749_v40, %v1851_v29  ;;  %v1508_v44 = vld [vmem:[%s2247_s1 + $0x10] ss:$8 sm:$0x3]  ;;  %s1499_s23 = sshll.u32 %s1762_s22, 4  ;;  %s1500_s23 = int_to_ptr.vmem [resolvable:$true] %s1499_s23 }
  0x34   :  { %v591_v61 = vadd.f32 %v588_v50, %v587_v49  ;;  %v692_v62 = vrot.slane %v670_v51, %v1851_v29  ;;  %v699_v63 = vrot.slane %v671_v52, %v1851_v29  ;;  %v766_v1 = vrot.slane %v750_v46, %v1851_v29  ;;  %v1524_v46 = vld [vmem:[%s2247_s1 + $0x1] ss:$8 sm:$0x3]  ;;  %v1533_v52 = vld [vmem:[%s2247_s1 + $0x2] ss:$8 sm:$0x3]  ;;  %p1737_p6 = scmp.lt.s32.totalorder %s1500_s23, %s1500_s23 }
  0x35   :  { %v773_v2 = vrot.slane %v751_v47, %v1851_v29  ;;  %v780_v3 = vrot.slane %v752_v59, %v1851_v29  ;;  %v862_v4 = vcombine.low %v1570_v41, %v1571_v42  ;;  %v863_v5 = vcombine.low %v1572_v43, %v1573_v48  ;;  %v133_v41 = vld [vmem:[%s2247_s1] ss:$8 sm:$0x3]  ;;  %s1732_s24 = scalar_lea.vmem %s1500_s23, 16  ;;  %s1736_s25 = scalar_lea.vmem %s1500_s23, 32 }
  0x36   :  { %592 = vadd.xlane.f32.xlu0 %v591_v61  ;;  %v700_v6 = vcombine.low %v678_v57, %v692_v62  ;;  %v701_v7 = vcombine.low %v685_v58, %v699_v63  ;;  %v781_v8 = vcombine.low %v759_v60, %v766_v1  ;;  %v782_v10 = vcombine.high %v759_v60, %v766_v1  ;;  %v1542_v57 = vld [vmem:[%s2247_s1 + $0x3] ss:$8 sm:$0x3]  ;;  %p1733_p5 = scmp.ne.s32.totalorder %s1500_s23, %s1732_s24  ;;  %p1738_p7 = scmp.lt.s32.totalorder %s1736_s25, %s1732_s24 }
  0x37   :  { %v783_v11 = vcombine.low %v773_v2, %v780_v3  ;;  %v784_v12 = vcombine.high %v773_v2, %v780_v3  ;;  %v864_v13 = vcombine.low %v1574_v53, %v1575_v54  ;;  %v865_v14 = vcombine.low %v1576_v55, %v1577_v56 }
  0x38   :  { %v704_v15 = vadd.f32 %v701_v7, %v700_v6  ;;  %v791_v16 = vrot.slane %v781_v8, %v1851_v29  ;;  %v798_v17 = vrot.slane %v782_v10, %v1851_v29  ;;  %v872_v18 = vrot.slane %v862_v4, %v1851_v29  ;;  %v1551_v6 = vld [vmem:[%s2247_s1 + $0x4] ss:$8 sm:$0x3]  ;;  %p1739_p8 = por %p1738_p7, %p1737_p6 }
  0x39   :  { %v805_v19 = vrot.slane %v783_v11, %v1851_v29  ;;  %v812_v20 = vrot.slane %v784_v12, %v1851_v29  ;;  %v879_v21 = vrot.slane %v863_v5, %v1851_v29  ;;  %v886_v22 = vrot.slane %v864_v13, %v1851_v29 }
  0x3a   :  { %705 = vadd.xlane.f32.xlu1 %v704_v15  ;;  %v893_v23 = vrot.slane %v865_v14, %v1851_v29  ;;  %v2059_v39 = vsub.s32 0, %v1821_v9  ;;  %v2062_v40 = vsub.s32 1, %v1821_v9  ;;  %vm1761_vm0 = vmmov 0   ;;  %p1740_p9 = pnand %p1739_p8, %p1733_p5 }
  0x3b   :  { %v813_v24 = vcombine.low %v791_v16, %v805_v19  ;;  %v814_v25 = vcombine.low %v798_v17, %v812_v20  ;;  %v894_v26 = vcombine.low %v872_v18, %v879_v21  ;;  %v895_v27 = vcombine.high %v872_v18, %v879_v21  ;;  %v1560_v18 = vld [vmem:[%s2247_s1 + $0x5] ss:$8 sm:$0x3] }
  0x3c   :  { %v896_v28 = vcombine.low %v886_v22, %v893_v23  ;;  %v897_v30 = vcombine.high %v886_v22, %v893_v23  ;;  %v138_v43 = vrot.slane %v133_v41, %v2059_v39  ;;  %v151_v48 = vrot.slane %v1508_v44, %v2059_v39 }
  0x3d   :  { %v817_v31 = vadd.f32 %v814_v25, %v813_v24  ;;  %v904_v32 = vrot.slane %v894_v26, %v1851_v29  ;;  %v911_v33 = vrot.slane %v895_v27, %v1851_v29  ;;  %v155_v49 = vrot.slane %v1508_v44, %v2062_v40 }
  0x3e   :  { %v918_v34 = vrot.slane %v896_v28, %v1851_v29  ;;  %v925_v35 = vrot.slane %v897_v30, %v1851_v29  ;;  %v142_v29 = vrot.slane %v133_v41, %v2062_v40  ;;  %v262_v53 = vrot.slane %v1524_v46, %v2059_v39  ;;  %v1569_v30 = vld [vmem:[%s2247_s1 + $0x6] ss:$8 sm:$0x3]  ;;  %v1578_v41 = vld [vmem:[%s2247_s1 + $0x7] ss:$8 sm:$0x3] }
  0x3f   :  { %818 = vadd.xlane.f32.xlu0 %v817_v31  ;;  %v266_v54 = vrot.slane %v1524_v46, %v2062_v40  ;;  %v375_v58 = vrot.slane %v1533_v52, %v2059_v39  ;;  %v379_v59 = vrot.slane %v1533_v52, %v2062_v40  ;;  %v488_v3 = vrot.slane %v1542_v57, %v2059_v39 }
  0x40   :  { %v926_v36 = vcombine.low %v904_v32, %v918_v34  ;;  %v927_v37 = vcombine.low %v911_v33, %v925_v35  ;;  %v492_v4 = vrot.slane %v1542_v57, %v2062_v40  ;;  %v601_v12 = vrot.slane %v1551_v6, %v2059_v39 }
  0x41   :  { %v605_v13 = vrot.slane %v1551_v6, %v2062_v40  ;;  %v714_v21 = vrot.slane %v1560_v18, %v2059_v39  ;;  %v718_v22 = vrot.slane %v1560_v18, %v2062_v40  ;;  %v827_v35 = vrot.slane %v1569_v30, %v2059_v39  ;;  %v1684_v6 = vld [vmem:[%s2248_s2 + $0x58] sm:$0xff]  }
  0x42   :  { %v930_v38 = vadd.f32 %v927_v37, %v926_v36  ;;  %v831_v36 = vrot.slane %v1569_v30, %v2062_v40  ;;  %v944_v46 = vrot.slane %v1578_v41, %v2062_v40  ;;  %vm1352_vm1 = vcmp.eq.s32.totalorder %v1821_v9, 0 }
  0x43   :  { %vm1358_vm4 = vcmp.eq.s32.totalorder %v1821_v9, 1  ;;  %vm1364_vm7 = vcmp.eq.s32.totalorder %v1821_v9, 2  ;;  %vm1370_vm10 = vcmp.eq.s32.totalorder %v1821_v9, 3  ;;  %vm1376_vm13 = vcmp.eq.s32.totalorder %v1821_v9, 4 }
  0x44   :  { %931 = vadd.xlane.f32.xlu1 %v930_v38 }
  0xb1   :  { %v130_v42 = vpop.xlane.xlu0 %129 }
  0xb2   :  { %v132_v45 = vmul.f32 0.00390625, %v130_v42  ;;  %v367_v47 = vpop.xlane.xlu1 %366 }
  0xb3   :  { %v368_v60 = vmul.f32 0.00390625, %v367_v47 }
  0xb4   :  { %v145_v50 = vmul.f32 %v138_v43, %v132_v45  ;;  %v146_v51 = vmul.f32 %v142_v29, %v132_v45  ;;  %v940_v45 = vrot.slane %v1578_v41, %v2059_v39 }
  0xb5   :  { %v382_v10 = vmul.f32 %v375_v58, %v368_v60  ;;  %v383_v11 = vmul.f32 %v379_v59, %v368_v60 }
  0xb6   :  { %v158_v61 = vadd.f32 %v151_v48, %v145_v50  ;;  %v159_v62 = vadd.f32 %v155_v49, %v146_v51 }
  0xba   :  { %v254_v55 = vpop.xlane.xlu0 %253 }
  0xbb   :  { %v255_v56 = vmul.f32 0.00390625, %v254_v55 }
  0xbd   :  { %v269_v63 = vmul.f32 %v262_v53, %v255_v56  ;;  %v270_v1 = vmul.f32 %v266_v54, %v255_v56  ;;  %v480_v2 = vpop.xlane.xlu1 %479 }
  0xbe   :  { %v481_v5 = vmul.f32 0.00390625, %v480_v2  ;;  %v1680_v2 = vld [vmem:[%s2248_s2 + $0x48] sm:$0xff]  }
  0xbf   :  { %v271_v7 = vadd.f32 %v269_v63, %v158_v61  ;;  %v272_v8 = vadd.f32 %v270_v1, %v159_v62  ;;  %v1678_v63 = vld [vmem:[%s2248_s2 + $0x40] sm:$0xff]  }
  0xc0   :  { %v495_v16 = vmul.f32 %v488_v3, %v481_v5  ;;  %v496_v17 = vmul.f32 %v492_v4, %v481_v5  ;;  %v1679_v1 = vld [vmem:[%s2248_s2] sm:$0xff]   ;;  %1616 = vmatprep.subr.bf16.mxu0 %v1678_v63  ;;  %v1681_v3 = vld [vmem:[%s2248_s2 + $0x8] sm:$0xff]   ;;  %v1682_v4 = vld [vmem:[%s2248_s2 + $0x50] sm:$0xff]  }
  0xc1   :  { %v384_v14 = vadd.f32 %v382_v10, %v271_v7  ;;  %v385_v15 = vadd.f32 %v383_v11, %v272_v8  ;;  %1617 = vmatpush3.bf16.msra.mxu0 %v1679_v1  ;;  %v1683_v5 = vld [vmem:[%s2248_s2 + $0x10] sm:$0xff]   ;;  %v1685_v7 = vld [vmem:[%s2248_s2 + $0x18] sm:$0xff]   ;;  %v1686_v8 = vld [vmem:[%s2248_s2 + $0x60] sm:$0xff]  }
  0xc2   :  { %1618 = vmatprep.subr.bf16.mxu0 %v1680_v2  ;;  %v1687_v10 = vld [vmem:[%s2248_s2 + $0x20] sm:$0xff]   ;;  %v1688_v11 = vld [vmem:[%s2248_s2 + $0x68] sm:$0xff]  }
  0xc3   :  { %v593_v19 = vpop.xlane.xlu0 %592  ;;  %v497_v23 = vadd.f32 %v495_v16, %v384_v14  ;;  %v498_v24 = vadd.f32 %v496_v17, %v385_v15  ;;  %v1691_v14 = vld [vmem:[%s2248_s2 + $0x30] sm:$0xff]   ;;  %v1692_v15 = vld [vmem:[%s2248_s2 + $0x78] sm:$0xff]  }
  0xc4   :  { %v594_v20 = vmul.f32 0.00390625, %v593_v19  ;;  %v1693_v16 = vld [vmem:[%s2248_s2 + $0x38] sm:$0xff]  }
  0xc5   :  { %1619 = vmatpush3.bf16.msra.mxu0 %v1681_v3 }
  0xc6   :  { %v608_v25 = vmul.f32 %v601_v12, %v594_v20  ;;  %v609_v26 = vmul.f32 %v605_v13, %v594_v20  ;;  %1620 = vmatprep.subr.bf16.mxu0 %v1682_v4  ;;  %v1689_v12 = vld [vmem:[%s2248_s2 + $0x28] sm:$0xff]   ;;  %v1690_v13 = vld [vmem:[%s2248_s2 + $0x70] sm:$0xff]  }
  0xc7   :  { %v706_v27 = vpop.xlane.xlu1 %705  ;;  %v1579_v20 = vld [vmem:[%s2247_s1 + $0x11] ss:$8 sm:$0x3] }
  0xc8   :  { %v707_v28 = vmul.f32 0.00390625, %v706_v27  ;;  %v610_v31 = vadd.f32 %v608_v25, %v497_v23  ;;  %v611_v32 = vadd.f32 %v609_v26, %v498_v24  ;;  %v977_v23 = vrot.slane %v1579_v20, %v2062_v40 }
  0xc9   :  { %1621 = vmatpush3.bf16.msra.mxu0 %v1683_v5 }
  0xca   :  { %v721_v33 = vmul.f32 %v714_v21, %v707_v28  ;;  %v722_v34 = vmul.f32 %v718_v22, %v707_v28  ;;  %1622 = vmatprep.subr.bf16.mxu0 %v1684_v6  ;;  %v1580_v21 = vld [vmem:[%s2247_s1 + $0x12] ss:$8 sm:$0x3]  ;;  %v973_v22 = vrot.slane %v1579_v20, %v2059_v39  ;;  %v1581_v6 = vld [vmem:[%s2247_s1 + $0x13] ss:$8 sm:$0x3] }
  0xcb   :  { %v988_v27 = vrot.slane %v1580_v21, %v2059_v39  ;;  %v992_v28 = vrot.slane %v1580_v21, %v2062_v40 }
  0xcc   :  { %v819_v37 = vpop.xlane.xlu0 %818  ;;  %v723_v42 = vadd.f32 %v721_v33, %v610_v31  ;;  %v724_v43 = vadd.f32 %v722_v34, %v611_v32 }
  0xcd   :  { %v820_v38 = vmul.f32 0.00390625, %v819_v37  ;;  %1623 = vmatpush3.bf16.msra.mxu0 %v1685_v7  ;;  %v1582_v7 = vld [vmem:[%s2247_s1 + $0x14] ss:$8 sm:$0x3] }
  0xce   :  { %1624 = vmatprep.subr.bf16.mxu0 %v1686_v8  ;;  %v1046_v8 = vrot.slane %v1581_v6, %v2062_v40 }
  0xcf   :  { %v834_v29 = vmul.f32 %v827_v35, %v820_v38  ;;  %v835_v44 = vmul.f32 %v831_v36, %v820_v38 }
  0xd1   :  { %v932_v47 = vpop.xlane.xlu1 %931  ;;  %v836_v48 = vadd.f32 %v834_v29, %v723_v42  ;;  %v837_v49 = vadd.f32 %v835_v44, %v724_v43  ;;  %1625 = vmatpush3.bf16.msra.mxu0 %v1687_v10 }
  0xd2   :  { %v933_v50 = vmul.f32 0.00390625, %v932_v47  ;;  %1626 = vmatprep.subr.bf16.mxu0 %v1688_v11  ;;  %v1042_v11 = vrot.slane %v1581_v6, %v2059_v39 }
  0xd4   :  { %v947_v51 = vmul.f32 %v940_v45, %v933_v50  ;;  %v948_v52 = vmul.f32 %v944_v46, %v933_v50 }
  0xd5   :  { %1627 = vmatpush3.bf16.msra.mxu0 %v1689_v12 }
  0xd6   :  { %v949_v53 = vadd.f32 %v947_v51, %v836_v48  ;;  %v950_v54 = vadd.f32 %v948_v52, %v837_v49  ;;  %1628 = vmatprep.subr.bf16.mxu0 %v1690_v13 }
  0xd8   :  { %v951_v55 = vadd.f32 %v950_v54, %v949_v53 }
  0xd9   :  { %1629 = vmatpush3.bf16.msra.mxu0 %v1691_v14  ;;  %v1061_v14 = vrot.slane %v1582_v7, %v2062_v40  ;;  %v1696_v40 = vld [vmem:[%s2249_s3 + $0x10] sm:$0xff]  }
  0xda   :  { %952 = vadd.xlane.f32.xlu0 %v951_v55  ;;  %1630 = vmatprep.subr.bf16.mxu0 %v1692_v15  ;;  %v1057_v15 = vrot.slane %v1582_v7, %v2059_v39  ;;  %v1695_v39 = vld [vmem:[%s2249_s3 + $0x8] sm:$0xff]  }
  0xdd   :  { %1631 = vmatpush3.bf16.msra.mxu0 %v1693_v16 }
 0x167   :  { %v953_v56 = vpop.xlane.xlu0 %952 }
 0x168   :  { %v954_v57 = vmul.f32 0.00390625, %v953_v56 }
 0x16a   :  { %v955_v58 = vsub.f32 %v949_v53, %v954_v57  ;;  %v956_v59 = vsub.f32 %v950_v54, %v954_v57 }
 0x16c   :  { %v957_v60 = vmul.f32 %v955_v58, %v955_v58  ;;  %v958_v61 = vmul.f32 %v956_v59, %v956_v59 }
 0x16e   :  { %v959_v62 = vadd.f32 %v958_v61, %v957_v60 }
 0x170   :  { %960 = vadd.xlane.f32.xlu1 %v959_v62 }
 0x1fd   :  { %v961_v17 = vpop.xlane.xlu1 %960 }
 0x1fe   :  { %v962_v18 = vmul.f32 0.00390625, %v961_v17 }
 0x200   :  { %v963_v19 = vadd.f32 1e-05, %v962_v18 }
 0x202   :  { %1702 = vrsqrt.f32 %v963_v19 }
 0x20c   :  { %v1703_v24 = vpop.eup %1702 }
 0x20d   :  { %v965_v25 = vmul.f32 %v1703_v24, %v955_v58  ;;  %v966_v26 = vmul.f32 %v1703_v24, %v956_v59  ;;  %v1760_v24 = vmov 0.0  }
 0x20e   :  { %1647 = vmatprep.subr.bf16.mxu1 %v1760_v24  ;;  %1663 = vmatprep.mubr.msk.bf16.mxu1 %vm1761_vm0, %v1760_v24  ;;  %vm1382_vm0 = vcmp.eq.s32.totalorder %v1821_v9, 5 }
 0x20f   :  { %v980_v30 = vmul.f32 %v973_v22, %v965_v25  ;;  %v981_v31 = vmul.f32 %v977_v23, %v966_v26  ;;  %v1694_v23 = vld [vmem:[%s2249_s3] sm:$0xff]   ;;  %v1697_v25 = vld [vmem:[%s2249_s3 + $0x18] sm:$0xff]  }
 0x210   :  { %1648 = vmatpush3.bf16.msra.mxu1 %v1694_v23 }
 0x211   :  { %v996_v32 = vadd.f32 %v992_v28, %v981_v31  ;;  %v995_v33 = vadd.f32 %v988_v27, %v980_v30  ;;  %1649 = vmatprep.subr.bf16.mxu1 %v1760_v24  ;;  %v1100_v27 = vld [vmem:[%s2247_s1 + $0x15] ss:$0 sm:$0xff] }
 0x213   :  { %v1003_v34 = vrot.slane %v996_v32, 4  ;;  %v997_v35 = vrot.slane %v995_v33, 4 }
 0x214   :  { %1650 = vmatpush3.bf16.msra.mxu1 %v1695_v39 }
 0x215   :  { %v1004_v36 = vadd.f32 %v1003_v34, %v996_v32  ;;  %v998_v37 = vadd.f32 %v997_v35, %v995_v33  ;;  %1651 = vmatprep.subr.bf16.mxu1 %v1760_v24  ;;  %v1698_v35 = vld [vmem:[%s2249_s3 + $0x20] sm:$0xff]  }
 0x217   :  { %v1005_v38 = vrot.slane %v1004_v36, 2  ;;  %v999_v41 = vrot.slane %v998_v37, 2 }
 0x218   :  { %1652 = vmatpush3.bf16.msra.mxu1 %v1696_v40 }
 0x219   :  { %v1006_v42 = vadd.f32 %v1005_v38, %v1004_v36  ;;  %v1000_v43 = vadd.f32 %v999_v41, %v998_v37  ;;  %1653 = vmatprep.subr.bf16.mxu1 %v1760_v24  ;;  %v1699_v36 = vld [vmem:[%s2249_s3 + $0x28] sm:$0xff]   ;;  %v1700_v37 = vld [vmem:[%s2249_s3 + $0x30] sm:$0xff]   ;;  %v1701_v38 = vld [vmem:[%s2249_s3 + $0x38] sm:$0xff]   ;;  %s2214_s3 = sld [smem:[#allocation2 + $0x6]] }
 0x21b   :  { %v1007_v29 = vrot.slane %v1006_v42, 1  ;;  %v1001_v44 = vrot.slane %v1000_v43, 1 }
 0x21c   :  { %1654 = vmatpush3.bf16.msra.mxu1 %v1697_v25 }
 0x21d   :  { %v1008_v45 = vadd.f32 %v1007_v29, %v1006_v42  ;;  %v1002_v46 = vadd.f32 %v1001_v44, %v1000_v43  ;;  %1655 = vmatprep.subr.bf16.mxu1 %v1760_v24 }
 0x21f   :  { %v1011_v47 = vmul.f32 0.125, %v1008_v45  ;;  %v1010_v48 = vmul.f32 0.125, %v1002_v46  ;;  %v1349_v45 = vand.u32 127, %v67_v0  ;;  %v1354_v46 = vstv %s1353_s14 }
 0x220   :  { %1656 = vmatpush3.bf16.msra.mxu1 %v1698_v35  ;;  %v1372_v0 = vstv %s1609_s17 }
 0x221   :  { %v1013_v49 = vsub.f32 %v996_v32, %v1011_v47  ;;  %v1012_v50 = vsub.f32 %v995_v33, %v1010_v48  ;;  %1657 = vmatprep.subr.bf16.mxu1 %v1760_v24  ;;  %vm1355_vm2 = vcmp.eq.s32.totalorder %v1349_v45, %v1354_v46  ;;  %v1360_v47 = vstv %s1607_s15 }
 0x222   :  { %vm1356_vm3 = vmand %vm1352_vm1, %vm1355_vm2  ;;  %vm1361_vm5 = vcmp.eq.s32.totalorder %v1349_v45, %v1360_v47  ;;  %v1366_v48 = vstv %s1608_s16  ;;  %vm1373_vm11 = vcmp.eq.s32.totalorder %v1349_v45, %v1372_v0 }
 0x223   :  { %v1015_v51 = vmul.f32 %v1013_v49, %v1013_v49  ;;  %v1014_v52 = vmul.f32 %v1012_v50, %v1012_v50  ;;  %vm1362_vm6 = vmand %vm1358_vm4, %vm1361_vm5  ;;  %vm1367_vm8 = vcmp.eq.s32.totalorder %v1349_v45, %v1366_v48 }
 0x224   :  { %1658 = vmatpush3.bf16.msra.mxu1 %v1699_v36  ;;  %vm1368_vm9 = vmand %vm1364_vm7, %vm1367_vm8 }
 0x225   :  { %v1022_v53 = vrot.slane %v1015_v51, 4  ;;  %v1016_v54 = vrot.slane %v1014_v52, 4  ;;  %1659 = vmatprep.subr.bf16.mxu1 %v1760_v24  ;;  %vm1374_vm12 = vmand %vm1370_vm10, %vm1373_vm11  ;;  %vm1435_vm10 = vcmask 1040384  }
 0x227   :  { %v1023_v55 = vadd.f32 %v1022_v53, %v1015_v51  ;;  %v1017_v56 = vadd.f32 %v1016_v54, %v1014_v52  ;;  %v1378_v51 = vstv %s1610_s18  ;;  %v1384_v53 = vstv %s1611_s19 }
 0x228   :  { %1660 = vmatpush3.bf16.msra.mxu1 %v1700_v37  ;;  %vm1379_vm14 = vcmp.eq.s32.totalorder %v1349_v45, %v1378_v51  ;;  %vm1385_vm1 = vcmp.eq.s32.totalorder %v1349_v45, %v1384_v53 }
 0x229   :  { %v1024_v57 = vrot.slane %v1023_v55, 2  ;;  %v1018_v58 = vrot.slane %v1017_v56, 2  ;;  %1661 = vmatprep.subr.bf16.mxu1 %v1760_v24  ;;  %vm1380_vm15 = vmand %vm1376_vm13, %vm1379_vm14 }
 0x22a   :  { %vm1386_vm2 = vmand %vm1382_vm0, %vm1385_vm1  ;;  %vm1491_vm0 = vcmask 0  }
 0x22b   :  { %v1025_v59 = vadd.f32 %v1024_v57, %v1023_v55  ;;  %v1019_v60 = vadd.f32 %v1018_v58, %v1017_v56  ;;  %v1390_v55 = vstv %s2214_s3  ;;  %v1396_v57 = vstv %s2217_s20 }
 0x22c   :  { %1662 = vmatpush3.bf16.msra.mxu1 %v1701_v38  ;;  %vm1391_vm4 = vcmp.eq.s32.totalorder %v1349_v45, %v1390_v55  ;;  %vm1397_vm7 = vcmp.eq.s32.totalorder %v1349_v45, %v1396_v57 }
 0x22d   :  { %v1026_v61 = vrot.slane %v1025_v59, 1  ;;  %v1020_v62 = vrot.slane %v1019_v60, 1 }
 0x22f   :  { %v1027_v63 = vadd.f32 %v1026_v61, %v1025_v59  ;;  %v1021_v1 = vadd.f32 %v1020_v62, %v1019_v60 }
 0x231   :  { %v1029_v2 = vmul.f32 0.125, %v1027_v63  ;;  %v1028_v3 = vmul.f32 0.125, %v1021_v1 }
 0x233   :  { %v1031_v4 = vadd.f32 1e-05, %v1029_v2  ;;  %v1030_v5 = vadd.f32 1e-05, %v1028_v3 }
 0x235   :  { %1704 = vrsqrt.f32 %v1031_v4 }
 0x236   :  { %1706 = vrsqrt.f32 %v1030_v5 }
 0x23f   :  { %v1705_v10 = vpop.eup %1704 }
 0x240   :  { %v1707_v12 = vpop.eup %1706  ;;  %v1035_v13 = vmul.f32 %v1705_v10, %v1013_v49  ;;  %v1357_v49 = vsel %vm1356_vm3, 1.0, %v1760_v24  ;;  %vm1388_vm3 = vcmp.eq.s32.totalorder %v1821_v9, 6 }
 0x241   :  { %v1034_v16 = vmul.f32 %v1707_v12, %v1012_v50  ;;  %v1363_v50 = vsel %vm1362_vm6, 1.0, %v1357_v49  ;;  %vm1392_vm5 = vmand %vm1388_vm3, %vm1391_vm4  ;;  %vm1394_vm6 = vcmp.eq.s32.totalorder %v1821_v9, 7 }
 0x242   :  { %v1050_v17 = vmul.f32 %v1046_v8, %v1035_v13  ;;  %v1369_v52 = vsel %vm1368_vm9, 1.0, %v1363_v50  ;;  %vm1398_vm8 = vmand %vm1394_vm6, %vm1397_vm7  ;;  %vm1400_vm9 = vcmp.lt.s32.totalorder %v1349_v45, 100 }
 0x243   :  { %v1049_v18 = vmul.f32 %v1042_v11, %v1034_v16  ;;  %v1375_v54 = vsel %vm1374_vm12, 1.0, %v1369_v52  ;;  %v1614_v61 = vsel %vm1400_vm9, 1.0, %v1760_v24 }
 0x244   :  { %v1065_v19 = vadd.f32 %v1061_v14, %v1050_v17  ;;  %v1381_v56 = vsel %vm1380_vm15, 1.0, %v1375_v54 }
 0x245   :  { %v1064_v20 = vadd.f32 %v1057_v15, %v1049_v18  ;;  %v1387_v58 = vsel %vm1386_vm2, 1.0, %v1381_v56 }
 0x246   :  { %v1067_v21 = vpack.c.bf16 %v1065_v19, %v1065_v19  ;;  %v1393_v59 = vsel %vm1392_vm5, 1.0, %v1387_v58 }
 0x247   :  { %v1066_v22 = vpack.c.bf16 %v1064_v20, %v1064_v20  ;;  %v1399_v60 = vsel %vm1398_vm8, 1.0, %v1393_v59 }
 0x248   :  { %1229 = vmatprep.mubr.bf16.mxu0 %v1067_v21  ;;  %v1403_v62 = vsub.f32 %v1614_v61, %v1399_v60  ;;  %v1426_v63 = vrot.slane %v1399_v60, 4  ;;  %vm1410_vm13 = vcmp.gt.f32.partialorder %v1399_v60, 0.0 }
 0x249   :  { %1230 = vmatmul.mubr.bf16.vlgmr.msra.gmra.mrb[0].mxu0 %v1066_v22 }
 0x24a   :  { %v1427_v1 = vadd.f32 %v1426_v63, %v1399_v60  ;;  %vm1418_vm12 = vcmp.gt.f32.partialorder %v1403_v62, 0.0 }
 0x24c   :  { %v1428_v2 = vrot.slane %v1427_v1, 2 }
 0x24e   :  { %v1429_v3 = vadd.f32 %v1428_v2, %v1427_v1 }
 0x250   :  { %v1430_v4 = vrot.slane %v1429_v3, 1 }
 0x252   :  { %v1431_v5 = vadd.f32 %v1430_v4, %v1429_v3 }
 0x254   :  { %vm1432_vm11 = vcmp.gt.f32.partialorder %v1431_v5, 0.0 }
 0x255   :  { %v1615_v6 = vsel %vm1432_vm11, 1.0, %v1760_v24 }
 0x256   :  { %v1436_v9 = vsel %vm1435_vm10, %v1615_v6, 0.0 }
 0x257   :  { %1437 = vadd.xlane.f32.xlu1 %v1436_v9 }
 0x2e4   :  { %v1438_v48 = vpop.xlane.xlu1 %1437 }
 0x2e5   :  { %v1439_v49 = vrot.slane %v1438_v48, 4 }
 0x2e7   :  { %v1440_v51 = vadd.f32 %v1439_v49, %v1438_v48 }
 0x2e9   :  { %v1441_v52 = vrot.slane %v1440_v51, 2 }
 0x2eb   :  { %v1442_v53 = vadd.f32 %v1441_v52, %v1440_v51 }
 0x2ed   :  { %v1443_v54 = vrot.slane %v1442_v53, 1 }
 0x2ef   :  { %v1444_v55 = vadd.f32 %v1443_v54, %v1442_v53 }
 0x2f1   :  { %1667 = vpush %v1444_v55 }
 0x31c   :  { %v1632_v26 = vpop.f32.mrb[0].mxu0 }
 0x31d   :  { %v1633_v28 = vpop.f32.mrb[1].mxu0 }
 0x31e   :  { %v1634_v30 = vadd.f32 %v1633_v28, %v1632_v26  ;;  %v1635_v31 = vpop.f32.mrb[2].mxu0 }
 0x31f   :  { %v1636_v32 = vpop.f32.mrb[3].mxu0 }
 0x320   :  { %v1232_v33 = vadd.f32 %v1634_v30, %v1100_v27 }
 0x322   :  { %v1237_v34 = vmul.f32 %v1232_v33, %v1232_v33  ;;  %s1668_s2 = spop %1667 }
 0x323   :  { %v1446_v9 = vstv %s1668_s2 }
 0x324   :  { %1238 = vadd.xlane.f32.xlu0 %v1237_v34 }
 0x3b1   :  { %v1239_v41 = vpop.xlane.xlu0 %1238 }
 0x3b2   :  { %v1240_v42 = vadd.f32 1e-12, %v1239_v41 }
 0x3b4   :  { %1708 = vrsqrt.f32 %v1240_v42 }
 0x3be   :  { %v1709_v43 = vpop.eup %1708 }
 0x3bf   :  { %v1242_v29 = vmul.f32 %v1709_v43, %v1232_v33 }
 0x3c1   :  { %v1243_v44 = vpack.c.bf16 %v1242_v29, %v1242_v29 }
 0x3c3   :  { %1664 = vmatmul.mubr.bf16.vlgmr.msra.gmra.mrb[0].mxu1 %v1243_v44 }
 0x496   :  { %v1342_v7 = vpop.f32.mrb[0].mxu1 }
 0x497   :  { %v1404_v8 = vmul.f32 32.0, %v1342_v7  ;;  %v1665_v10 = vpop.f32.mrb[1].mxu1 }
 0x498   :  { %v1345_v11 = vpop.f32.mrb[2].mxu1 }
 0x499   :  { %v1405_v12 = vmul.f32 1.442695, %v1404_v8  ;;  %v1666_v13 = vpop.f32.mrb[3].mxu1 }
 0x49b   :  { %1710 = vpow2.f32 %v1405_v12 }
 0x4a5   :  { %v1711_v14 = vpop.eup %1710 }
 0x4a6   :  { %1712 = vrcp.f32 %v1711_v14  ;;  %v1409_v15 = vmul.f32 24.53253, %v1711_v14 }
 0x4a8   :  { %v1419_v16 = vsel %vm1418_vm12, %v1409_v15, 0.0 }
 0x4a9   :  { %v1420_v17 = vrot.slane %v1419_v16, 4 }
 0x4ab   :  { %v1421_v18 = vadd.f32 %v1420_v17, %v1419_v16 }
 0x4ad   :  { %v1422_v19 = vrot.slane %v1421_v18, 2 }
 0x4af   :  { %v1423_v20 = vadd.f32 %v1422_v19, %v1421_v18 }
 0x4b0   :  { %v1713_v21 = vpop.eup %1712 }
 0x4b1   :  { %v1408_v22 = vmul.f32 24.53253, %v1713_v21  ;;  %v1424_v23 = vrot.slane %v1423_v20, 1 }
 0x4b3   :  { %v1411_v24 = vsel %vm1410_vm13, %v1408_v22, 0.0  ;;  %v1425_v39 = vadd.f32 %v1424_v23, %v1423_v20 }
 0x4b4   :  { %v1412_v40 = vrot.slane %v1411_v24, 4 }
 0x4b5   :  { %v1469_v25 = vadd.f32 1.0, %v1425_v39  ;;  %v1472_v28 = vmul.f32 -0.5, %v1425_v39  ;;  %v1475_v34 = vand.u32 2147483647, %v1425_v39 }
 0x4b6   :  { %v1413_v26 = vadd.f32 %v1412_v40, %v1411_v24 }
 0x4b7   :  { %1714 = vlog2.f32 %v1469_v25  ;;  %v1473_v32 = vadd.f32 1.0, %v1472_v28  ;;  %vm1476_vm14 = vcmp.lt.f32.partialorder %v1475_v34, 0.0004427343 }
 0x4b8   :  { %v1414_v27 = vrot.slane %v1413_v26, 2 }
 0x4b9   :  { %v1474_v38 = vmul.f32 %v1473_v32, %v1425_v39 }
 0x4ba   :  { %v1415_v30 = vadd.f32 %v1414_v27, %v1413_v26 }
 0x4bc   :  { %v1416_v31 = vrot.slane %v1415_v30, 1 }
 0x4be   :  { %v1417_v33 = vadd.f32 %v1416_v31, %v1415_v30 }
 0x4c0   :  { %v1447_v35 = vadd.f32 1.0, %v1417_v33  ;;  %v1450_v43 = vmul.f32 -0.5, %v1417_v33  ;;  %v1453_v44 = vand.u32 2147483647, %v1417_v33 }
 0x4c1   :  { %v1715_v36 = vpop.eup %1714 }
 0x4c2   :  { %v1471_v37 = vmul.f32 0.6931472, %v1715_v36  ;;  %1716 = vlog2.f32 %v1447_v35  ;;  %v1451_v29 = vadd.f32 1.0, %v1450_v43  ;;  %vm1454_vm15 = vcmp.lt.f32.partialorder %v1453_v44, 0.0004427343 }
 0x4c3   :  { %1718 = vrcp.f32 %v1446_v9 }
 0x4c4   :  { %v1477_v41 = vsel %vm1476_vm14, %v1474_v38, %v1471_v37  ;;  %v1452_v47 = vmul.f32 %v1451_v29, %v1417_v33 }
 0x4c5   :  { %v1478_v42 = vsel %vm1435_vm10, %v1477_v41, 0.0 }
 0x4c6   :  { %1479 = vadd.xlane.f32.xlu1 %v1478_v42 }
 0x4cc   :  { %v1717_v45 = vpop.eup %1716 }
 0x4cd   :  { %v1449_v46 = vmul.f32 0.6931472, %v1717_v45  ;;  %v1719_v7 = vpop.eup %1718 }
 0x4cf   :  { %v1455_v0 = vsel %vm1454_vm15, %v1452_v47, %v1449_v46 }
 0x4d0   :  { %v1456_v50 = vsel %vm1435_vm10, %v1455_v0, 0.0 }
 0x4d1   :  { %1457 = vadd.xlane.f32.xlu0 %v1456_v50 }
 0x553   :  { %v1480_v56 = vpop.xlane.xlu1 %1479 }
 0x554   :  { %v1481_v57 = vrot.slane %v1480_v56, 4 }
 0x556   :  { %v1482_v58 = vadd.f32 %v1481_v57, %v1480_v56 }
 0x558   :  { %v1483_v59 = vrot.slane %v1482_v58, 2 }
 0x55a   :  { %v1484_v63 = vadd.f32 %v1483_v59, %v1482_v58 }
 0x55c   :  { %v1485_v3 = vrot.slane %v1484_v63, 1 }
 0x55e   :  { %v1458_v60 = vpop.xlane.xlu0 %1457  ;;  %v1486_v6 = vadd.f32 %v1485_v3, %v1484_v63 }
 0x55f   :  { %v1459_v61 = vrot.slane %v1458_v60, 4 }
 0x561   :  { %v1460_v62 = vadd.f32 %v1459_v61, %v1458_v60 }
 0x563   :  { %v1461_v1 = vrot.slane %v1460_v62, 2 }
 0x565   :  { %v1462_v2 = vadd.f32 %v1461_v1, %v1460_v62 }
 0x567   :  { %v1463_v4 = vrot.slane %v1462_v2, 1 }
 0x569   :  { %v1464_v5 = vadd.f32 %v1463_v4, %v1462_v2 }
 0x56b   :  { %1669 = vpush %v1464_v5 }
 0x56c   :  { %1671 = vpush %v1486_v6 }
 0x59c   :  { %s1670_s0 = spop %1669 }
 0x59d   :  { %v1466_v8 = vstv %s1670_s0  ;;  %s1672_s21 = spop %1671 }
 0x59e   :  { %v1468_v10 = vmul.f32 %v1719_v7, %v1466_v8  ;;  %v1488_v11 = vstv %s1672_s21 }
 0x59f   :  { %v1489_v12 = vmul.f32 0.01, %v1488_v11 }
 0x5a1   :  { %v1490_v13 = vadd.f32 %v1489_v12, %v1468_v10 }
 0x5a3   :  { %1492 = vst.msk [vmem:[#allocation5] sm:$0x1] %vm1491_vm0, %v1490_v13 }
 0x5a4   :  { %1743 = shalt.err (!%p1740_p9)
}
 0x5a5   :  { %s1744_s27 = scalar_lea.hbm %s2251_s5, 16 }
 0x5a6   :  { %p1745_p10 = scmp.ne.s32.totalorder %s2251_s5, %s1744_s27  ;;  %p1748_p11 = scmp.lt.u32.totalorder %s1744_s27, %s2251_s5 }
 0x5a8   :  { %p1750_p12 = pnand %p1748_p11, %p1745_p10 }
 0x5aa   :  { %1753 = shalt.err (!%p1750_p12)
}
 0x5ab   :  { %1502 = dma.vmem_to_hbm [thread:$0]  %s1500_s23, 16, %s2251_s5, [#allocation3]  }
 0x5ac   :  { %1756 = dma.done.wait [#allocation3], 16  }
 0x5ad   :  { %1757 = vsyncadd [#allocation3], 4294967280 }
 0x5ae   :  { %1506 = vsyncpa [#allocation3], 1 }
 0x5af   :  { %1507 = vsyncpa [#allocation4], 1 }

</bundles_post_ra>
